<compile_context>
chip_gen: v7x
topology: tpu7x:2x2x1
jax: 0.10.0
libtpu: 0.0.40
codegen_flags: <defaults>
</compile_context>

<pallas_src>
import functools

import jax
import jax.numpy as jnp
from jax.experimental import pallas as pl
from jax.experimental.pallas import tpu as pltpu

LANE = 128  # lane-dense output width for all matmul kernels


# ----------------------------------------------------------------------------
# small helpers
# ----------------------------------------------------------------------------
def _round_up(x, m):
    return (x + m - 1) // m * m


def _pad_cols(arr, n_pad):
    n = arr.shape[-1]
    if n == n_pad:
        return arr
    pad = [(0, 0)] * (arr.ndim - 1) + [(0, n_pad - n)]
    return jnp.pad(arr, pad)


def _pad_rows(arr, m_pad):
    m = arr.shape[0]
    if m == m_pad:
        return arr
    return jnp.pad(arr, ((0, m_pad - m),) + ((0, 0),) * (arr.ndim - 1))


# ----------------------------------------------------------------------------
# Pallas kernels
# ----------------------------------------------------------------------------
def _linear_kernel(a_ref, w_ref, b_ref, o_ref, *, apply_relu):
    # a: (TM, K) bf16, w: (K, 128) bf16, b: (1, 128) f32 -> o: (TM, 128) f32
    y = jnp.dot(a_ref[...], w_ref[...], preferred_element_type=jnp.float32)
    y = y + b_ref[...]
    if apply_relu:
        y = jnp.maximum(y, 0.0)
    o_ref[...] = y


def pallas_linear(a, w_pad, b_pad, *, apply_relu, n_real, tile_m=512):
    """relu?(a @ w + b) with an M-tiled, pipelined Pallas kernel.

    a:     (M, K) activations (cast to bf16 for the MXU).
    w_pad: (K, 128) bf16 weight, zero-padded beyond n_real columns.
    b_pad: (1, 128) f32 bias, zero-padded beyond n_real columns.
    Returns (M, n_real) f32.
    """
    m, k = a.shape
    n_pad = w_pad.shape[1]
    tm = min(tile_m, _round_up(m, 8))      # sublane-aligned tile, <= tile_m
    m_pad = _round_up(m, tm)
    a_p = _pad_rows(a.astype(jnp.bfloat16), m_pad)

    out = pl.pallas_call(
        functools.partial(_linear_kernel, apply_relu=apply_relu),
        out_shape=jax.ShapeDtypeStruct((m_pad, n_pad), jnp.float32),
        grid_spec=pltpu.PrefetchScalarGridSpec(
            num_scalar_prefetch=0,
            grid=(m_pad // tm,),
            in_specs=[
                pl.BlockSpec((tm, k), lambda i: (i, 0)),       # activation tile
                pl.BlockSpec((k, n_pad), lambda i: (0, 0)),    # resident weight
                pl.BlockSpec((1, n_pad), lambda i: (0, 0)),    # resident bias
            ],
            out_specs=pl.BlockSpec((tm, n_pad), lambda i: (i, 0)),
        ),
        compiler_params=pltpu.CompilerParams(
            dimension_semantics=("parallel",),        # shard M across TCs (v7x)
            vmem_limit_bytes=32 * 1024 * 1024,        # explicit, fits v5e/v6e/v7x
        ),
    )(a_p, w_pad, b_pad)
    return out[:m, :n_real]


def _tail_kernel(h_ref, fc1w_ref, fc1b_ref, hdw_ref, hdb_ref, targ_ref,
                 valid_ref, loss_ref):
    """Fused fc1 -> (both task heads) -> per-task mean cross-entropy.

    h:    (Bp, 500) bf16   flattened conv features (rows >= B are zero padding)
    fc1w: (500, 128) bf16  cols >= 50 zero-padded
    fc1b: (1, 128) f32
    hdw:  (128, 128) bf16  lanes [0,10)=task0 head, [10,20)=task1 head
    hdb:  (1, 128) f32
    targ: (Bp, 128) f32    one-hot labels at lanes [0,10) / [10,20)
    valid:(Bp, 1) f32      1/B for real rows, 0 for padding rows
    loss: (1, 2) f32
    """
    h1 = jnp.dot(h_ref[...], fc1w_ref[...], preferred_element_type=jnp.float32)
    h1 = jnp.maximum(h1 + fc1b_ref[...], 0.0)                    # (Bp, 128)
    logits = jnp.dot(h1.astype(jnp.bfloat16), hdw_ref[...],
                     preferred_element_type=jnp.float32)
    logits = logits + hdb_ref[...]                               # (Bp, 128)

    lane = jax.lax.broadcasted_iota(jnp.int32, logits.shape, 1)
    targ = targ_ref[...]
    valid = valid_ref[...]                                       # (Bp, 1)

    per_task = []
    for t in range(2):
        mask = (lane >= t * 10) & (lane < (t + 1) * 10)
        lt = jnp.where(mask, logits, -jnp.inf)
        m = jnp.max(lt, axis=-1, keepdims=True)                  # (Bp, 1)
        e = jnp.exp(lt - m)                                      # 0 outside mask
        lse = jnp.log(jnp.sum(e, axis=-1, keepdims=True)) + m    # (Bp, 1)
        picked = jnp.sum(jnp.where(mask, targ * logits, 0.0),
                         axis=-1, keepdims=True)                 # (Bp, 1)
        # mean over real batch rows (valid carries the 1/B weight)
        per_task.append(jnp.sum((lse - picked) * valid, axis=0, keepdims=True))
    loss_ref[...] = jnp.concatenate(per_task, axis=-1)           # (1, 2)


def pallas_tail(hflat, fc1_w, fc1_b, heads_w, heads_b, targ, valid):
    out = pl.pallas_call(
        _tail_kernel,
        out_shape=jax.ShapeDtypeStruct((1, 2), jnp.float32),
        in_specs=[pl.BlockSpec(memory_space=pltpu.MemorySpace.VMEM)] * 7,
        out_specs=pl.BlockSpec(memory_space=pltpu.MemorySpace.VMEM),
        compiler_params=pltpu.CompilerParams(vmem_limit_bytes=32 * 1024 * 1024),
    )(hflat, fc1_w, fc1_b, heads_w, heads_b, targ, valid)
    return out[0]                                                # (2,)


# ----------------------------------------------------------------------------
# Plain-JAX glue (NHWC): im2col patch extraction and 2x2 max pooling
# ----------------------------------------------------------------------------
def im2col_nhwc(x, kh, kw):
    """x: (B, H, W, C) -> (B*Ho*Wo, kh*kw*C), stride 1, VALID, row order (kh,kw,C)."""
    b, h, w, c = x.shape
    ho, wo = h - kh + 1, w - kw + 1
    cols = []
    for i in range(kh):
        for j in range(kw):
            cols.append(x[:, i:i + ho, j:j + wo, :])             # (B, Ho, Wo, C)
    p = jnp.stack(cols, axis=3)                                   # (B, Ho, Wo, kh*kw, C)
    return p.reshape(b * ho * wo, kh * kw * c)


def maxpool_2x2_nhwc(x):
    b, h, w, c = x.shape
    return x.reshape(b, h // 2, 2, w // 2, 2, c).max(axis=(2, 4))


# ----------------------------------------------------------------------------
# RegressionTrain forward: model (LeNet) + per-task cross-entropy
# ----------------------------------------------------------------------------
def regression_train_forward(params, x, ts):
    """x: (B, 1, 36, 36) f32 NCHW, ts: (B, 2) int labels -> task_loss (2,) f32."""
    b = x.shape[0]
    xh = jnp.transpose(x, (0, 2, 3, 1)).astype(jnp.bfloat16)     # NHWC

    # conv1: 1 -> 10, 9x9 + ReLU (im2col matmul), then 2x2 max pool
    a = im2col_nhwc(xh, 9, 9)                                    # (B*28*28, 81)
    h = pallas_linear(a, params["conv1_w"], params["conv1_b"],
                      apply_relu=True, n_real=10)
    h = h.reshape(b, 28, 28, 10)
    h = maxpool_2x2_nhwc(h).astype(jnp.bfloat16)                 # (B,14,14,10)

    # conv2: 10 -> 20, 5x5 + ReLU, then 2x2 max pool
    a = im2col_nhwc(h, 5, 5)                                     # (B*10*10, 250)
    h = pallas_linear(a, params["conv2_w"], params["conv2_b"],
                      apply_relu=True, n_real=20)
    h = h.reshape(b, 10, 10, 20)
    h = maxpool_2x2_nhwc(h)                                      # (B,5,5,20)

    hflat = h.reshape(b, 20 * 5 * 5).astype(jnp.bfloat16)        # (B,500) NHWC order

    # pad batch to a sublane multiple for the fused tail kernel
    bp = _round_up(b, 8)
    hflat = _pad_rows(hflat, bp)

    # one-hot targets packed into 128 lanes: task0 at [0,10), task1 at [10,20)
    onehot0 = jax.nn.one_hot(ts[:, 0], 10, dtype=jnp.float32)
    onehot1 = jax.nn.one_hot(ts[:, 1], 10, dtype=jnp.float32)
    targ = jnp.zeros((bp, LANE), jnp.float32)
    targ = targ.at[:b, 0:10].set(onehot0).at[:b, 10:20].set(onehot1)

    valid = jnp.zeros((bp, 1), jnp.float32).at[:b, 0].set(1.0 / b)

    # fused fc1 -> heads -> cross-entropy (single kernel, single launch)
    return pallas_tail(hflat, params["fc1_w"], params["fc1_b"],
                       params["heads_w"], params["heads_b"], targ, valid)


# ----------------------------------------------------------------------------
# Deterministic parameter init (shapes from the PMTL LeNet __init__),
# stored pre-padded to 128 lanes / pre-cast for the MXU.
# ----------------------------------------------------------------------------
def init_params(key):
    ks = jax.random.split(key, 10)

    def nrm(k, shape, scale):
        return jax.random.normal(k, shape, jnp.float32) * scale

    def pad_w(w):  # (K, N) -> (K, 128) bf16
        return _pad_cols(w, LANE).astype(jnp.bfloat16)

    def pad_b(bvec):  # (N,) -> (1, 128) f32
        return _pad_cols(bvec.reshape(1, -1), LANE).astype(jnp.float32)

    # conv weights flattened as (kh*kw*Cin, Cout) matching the NHWC im2col order.
    conv1_w = nrm(ks[0], (9 * 9 * 1, 10), 0.1)
    conv1_b = nrm(ks[1], (10,), 0.1)
    conv2_w = nrm(ks[2], (5 * 5 * 10, 20), 0.05)
    conv2_b = nrm(ks[3], (20,), 0.05)
    fc1_w = nrm(ks[4], (500, 50), 0.05)
    fc1_b = nrm(ks[5], (50,), 0.05)
    task0_w = nrm(ks[6], (50, 10), 0.1)
    task0_b = nrm(ks[7], (10,), 0.1)
    task1_w = nrm(ks[8], (50, 10), 0.1)
    task1_b = nrm(ks[9], (10,), 0.1)

    # both task heads fused into one lane-padded (128, 128) weight:
    # rows >= 50 zero (match padded fc1 output lanes), cols [0,10)=task0,
    # [10,20)=task1, rest zero.
    heads_w = jnp.zeros((LANE, LANE), jnp.float32)
    heads_w = heads_w.at[:50, 0:10].set(task0_w).at[:50, 10:20].set(task1_w)
    heads_b = jnp.zeros((1, LANE), jnp.float32)
    heads_b = heads_b.at[0, 0:10].set(task0_b).at[0, 10:20].set(task1_b)

    return {
        "conv1_w": pad_w(conv1_w),                # (81, 128) bf16
        "conv1_b": pad_b(conv1_b),                # (1, 128) f32
        "conv2_w": pad_w(conv2_w),                # (250, 128) bf16
        "conv2_b": pad_b(conv2_b),
        "fc1_w": pad_w(fc1_w),                    # (500, 128) bf16
        "fc1_b": pad_b(fc1_b),
        "heads_w": heads_w.astype(jnp.bfloat16),  # (128, 128) bf16
        "heads_b": heads_b,                       # (1, 128) f32
        # RegressionTrain.weights (init_weight) — a parameter of the module,
        # deliberately unused in forward(), exactly like the PyTorch code.
        "pref_weights": jnp.array([0.5, 0.5], jnp.float32),
    }


if __name__ == "__main__":
    key = jax.random.PRNGKey(0)
    kx, kt, kp = jax.random.split(key, 3)

    B = 4
    x = jax.random.normal(kx, (B, 1, 36, 36), jnp.float32)   # MultiMNIST-style input
    ts = jax.random.randint(kt, (B, 2), 0, 10)                # per-task class labels
    params = init_params(kp)

    fwd = jax.jit(regression_train_forward)
    task_loss = fwd(params, x, ts)
    task_loss = jax.block_until_ready(task_loss)

    assert task_loss.shape == (2,), task_loss.shape
    assert bool(jnp.all(jnp.isfinite(task_loss)))
    print("KERNEL_OK")
</pallas_src>

<mosaic_0001>
module attributes {stable_mosaic.version = 11 : i64} {
  func.func @_linear_kernel(%arg0: i32, %arg1: memref<512x81xbf16, #tpu.memory_space<vmem>>, %arg2: memref<81x128xbf16, #tpu.memory_space<vmem>>, %arg3: memref<1x128xf32, #tpu.memory_space<vmem>>, %arg4: memref<512x128xf32, #tpu.memory_space<vmem>>) attributes {dimension_semantics = [#tpu.dimension_semantics<parallel>], iteration_bounds = array<i64: 7>, scalar_prefetch = 0 : i64, scratch_operands = 0 : i64, tpu.core_type = #tpu.core_type<tc>, window_params = [{transform_indices = @transform_0, window_bounds = array<i64: 512, 81>}, {pipeline_mode = #tpu.pipeline_mode<synchronous>, transform_indices = @transform_1, window_bounds = array<i64: 81, 128>}, {pipeline_mode = #tpu.pipeline_mode<synchronous>, transform_indices = @transform_2, window_bounds = array<i64: 1, 128>}, {transform_indices = @transform_3, window_bounds = array<i64: 512, 128>}]} {
    %c0 = arith.constant 0 : index
    %c0_0 = arith.constant 0 : index
    %0 = vector.load %arg1[%c0, %c0_0] : memref<512x81xbf16, #tpu.memory_space<vmem>>, vector<512x81xbf16>
    %c0_1 = arith.constant 0 : index
    %c0_2 = arith.constant 0 : index
    %1 = vector.load %arg2[%c0_1, %c0_2] : memref<81x128xbf16, #tpu.memory_space<vmem>>, vector<81x128xbf16>
    %cst = arith.constant dense<0.000000e+00> : vector<512x128xf32>
    %2 = tpu.matmul %0, %1, %cst {dimension_numbers = #tpu.dot_dimension_numbers<[1], [0], [0], [1], [0, 0, 1, 1], [], []>} : vector<512x81xbf16>, vector<81x128xbf16>, vector<512x128xf32> -> vector<512x128xf32>
    %c0_3 = arith.constant 0 : index
    %c0_4 = arith.constant 0 : index
    %3 = vector.load %arg3[%c0_3, %c0_4] : memref<1x128xf32, #tpu.memory_space<vmem>>, vector<1x128xf32>
    %4 = vector.broadcast %3 : vector<1x128xf32> to vector<512x128xf32>
    %5 = arith.addf %2, %4 : vector<512x128xf32>
    %cst_5 = arith.constant 0.000000e+00 : f32
    %6 = vector.broadcast %cst_5 : f32 to vector<512x128xf32>
    %7 = arith.maximumf %5, %6 : vector<512x128xf32>
    %c0_6 = arith.constant 0 : index
    %c0_7 = arith.constant 0 : index
    %8 = vector.load %arg4[%c0_6, %c0_7] : memref<512x128xf32, #tpu.memory_space<vmem>>, vector<512x128xf32>
    tpu.vector_store %arg4[%c0_6, %c0_7], %7 {strides = array<i32>} : memref<512x128xf32, #tpu.memory_space<vmem>>, vector<512x128xf32>,
    return
  }
  func.func @transform_0(%arg0: i32) -> (i32, i32) {
    %c0_i32 = arith.constant 0 : i32
    %c0_i32_0 = arith.constant 0 : i32
    return %arg0, %c0_i32 : i32, i32
  }
  func.func @transform_1(%arg0: i32) -> (i32, i32) {
    %c0_i32 = arith.constant 0 : i32
    %c0_i32_0 = arith.constant 0 : i32
    %c0_i32_1 = arith.constant 0 : i32
    return %c0_i32, %c0_i32_0 : i32, i32
  }
  func.func @transform_2(%arg0: i32) -> (i32, i32) {
    %c0_i32 = arith.constant 0 : i32
    %c0_i32_0 = arith.constant 0 : i32
    %c0_i32_1 = arith.constant 0 : i32
    return %c0_i32, %c0_i32_0 : i32, i32
  }
  func.func @transform_3(%arg0: i32) -> (i32, i32) {
    %c0_i32 = arith.constant 0 : i32
    %c0_i32_0 = arith.constant 0 : i32
    return %arg0, %c0_i32 : i32, i32
  }
}

module attributes {stable_mosaic.version = 11 : i64} {
  func.func @_linear_kernel(%arg0: i32, %arg1: memref<400x250xbf16, #tpu.memory_space<vmem>>, %arg2: memref<250x128xbf16, #tpu.memory_space<vmem>>, %arg3: memref<1x128xf32, #tpu.memory_space<vmem>>, %arg4: memref<400x128xf32, #tpu.memory_space<vmem>>) attributes {dimension_semantics = [#tpu.dimension_semantics<parallel>], iteration_bounds = array<i64: 1>, scalar_prefetch = 0 : i64, scratch_operands = 0 : i64, tpu.core_type = #tpu.core_type<tc>, window_params = [{transform_indices = @transform_0, window_bounds = array<i64: 400, 250>}, {pipeline_mode = #tpu.pipeline_mode<synchronous>, transform_indices = @transform_1, window_bounds = array<i64: 250, 128>}, {pipeline_mode = #tpu.pipeline_mode<synchronous>, transform_indices = @transform_2, window_bounds = array<i64: 1, 128>}, {transform_indices = @transform_3, window_bounds = array<i64: 400, 128>}]} {
    %c0 = arith.constant 0 : index
    %c0_0 = arith.constant 0 : index
    %0 = vector.load %arg1[%c0, %c0_0] : memref<400x250xbf16, #tpu.memory_space<vmem>>, vector<400x250xbf16>
    %c0_1 = arith.constant 0 : index
    %c0_2 = arith.constant 0 : index
    %1 = vector.load %arg2[%c0_1, %c0_2] : memref<250x128xbf16, #tpu.memory_space<vmem>>, vector<250x128xbf16>
    %cst = arith.constant dense<0.000000e+00> : vector<400x128xf32>
    %2 = tpu.matmul %0, %1, %cst {dimension_numbers = #tpu.dot_dimension_numbers<[1], [0], [0], [1], [0, 0, 1, 1], [], []>} : vector<400x250xbf16>, vector<250x128xbf16>, vector<400x128xf32> -> vector<400x128xf32>
    %c0_3 = arith.constant 0 : index
    %c0_4 = arith.constant 0 : index
    %3 = vector.load %arg3[%c0_3, %c0_4] : memref<1x128xf32, #tpu.memory_space<vmem>>, vector<1x128xf32>
    %4 = vector.broadcast %3 : vector<1x128xf32> to vector<400x128xf32>
    %5 = arith.addf %2, %4 : vector<400x128xf32>
    %cst_5 = arith.constant 0.000000e+00 : f32
    %6 = vector.broadcast %cst_5 : f32 to vector<400x128xf32>
    %7 = arith.maximumf %5, %6 : vector<400x128xf32>
    %c0_6 = arith.constant 0 : index
    %c0_7 = arith.constant 0 : index
    %8 = vector.load %arg4[%c0_6, %c0_7] : memref<400x128xf32, #tpu.memory_space<vmem>>, vector<400x128xf32>
    tpu.vector_store %arg4[%c0_6, %c0_7], %7 {strides = array<i32>} : memref<400x128xf32, #tpu.memory_space<vmem>>, vector<400x128xf32>,
    return
  }
  func.func @transform_0(%arg0: i32) -> (i32, i32) {
    %c0_i32 = arith.constant 0 : i32
    %c0_i32_0 = arith.constant 0 : i32
    return %arg0, %c0_i32 : i32, i32
  }
  func.func @transform_1(%arg0: i32) -> (i32, i32) {
    %c0_i32 = arith.constant 0 : i32
    %c0_i32_0 = arith.constant 0 : i32
    %c0_i32_1 = arith.constant 0 : i32
    return %c0_i32, %c0_i32_0 : i32, i32
  }
  func.func @transform_2(%arg0: i32) -> (i32, i32) {
    %c0_i32 = arith.constant 0 : i32
    %c0_i32_0 = arith.constant 0 : i32
    %c0_i32_1 = arith.constant 0 : i32
    return %c0_i32, %c0_i32_0 : i32, i32
  }
  func.func @transform_3(%arg0: i32) -> (i32, i32) {
    %c0_i32 = arith.constant 0 : i32
    %c0_i32_0 = arith.constant 0 : i32
    return %arg0, %c0_i32 : i32, i32
  }
}

module attributes {stable_mosaic.version = 11 : i64} {
  func.func @_tail_kernel(%arg0: memref<8x500xbf16, #tpu.memory_space<vmem>>, %arg1: memref<500x128xbf16, #tpu.memory_space<vmem>>, %arg2: memref<1x128xf32, #tpu.memory_space<vmem>>, %arg3: memref<128x128xbf16, #tpu.memory_space<vmem>>, %arg4: memref<1x128xf32, #tpu.memory_space<vmem>>, %arg5: memref<8x128xf32, #tpu.memory_space<vmem>>, %arg6: memref<8x1xf32, #tpu.memory_space<vmem>>, %arg7: memref<1x2xf32, #tpu.memory_space<vmem>>) attributes {dimension_semantics = [], scalar_prefetch = 0 : i64, scratch_operands = 0 : i64, tpu.core_type = #tpu.core_type<tc>} {
    %c0 = arith.constant 0 : index
    %c0_0 = arith.constant 0 : index
    %0 = vector.load %arg0[%c0, %c0_0] : memref<8x500xbf16, #tpu.memory_space<vmem>>, vector<8x500xbf16>
    %c0_1 = arith.constant 0 : index
    %c0_2 = arith.constant 0 : index
    %1 = vector.load %arg1[%c0_1, %c0_2] : memref<500x128xbf16, #tpu.memory_space<vmem>>, vector<500x128xbf16>
    %cst = arith.constant dense<0.000000e+00> : vector<8x128xf32>
    %2 = tpu.matmul %0, %1, %cst {dimension_numbers = #tpu.dot_dimension_numbers<[1], [0], [0], [1], [0, 0, 1, 1], [], []>} : vector<8x500xbf16>, vector<500x128xbf16>, vector<8x128xf32> -> vector<8x128xf32>
    %c0_3 = arith.constant 0 : index
    %c0_4 = arith.constant 0 : index
    %3 = vector.load %arg2[%c0_3, %c0_4] : memref<1x128xf32, #tpu.memory_space<vmem>>, vector<1x128xf32>
    %4 = vector.broadcast %3 : vector<1x128xf32> to vector<8x128xf32>
    %5 = arith.addf %2, %4 : vector<8x128xf32>
    %cst_5 = arith.constant 0.000000e+00 : f32
    %6 = vector.broadcast %cst_5 : f32 to vector<8x128xf32>
    %7 = arith.maximumf %5, %6 : vector<8x128xf32>
    %8 = arith.truncf %7 : vector<8x128xf32> to vector<8x128xbf16>
    %c0_6 = arith.constant 0 : index
    %c0_7 = arith.constant 0 : index
    %9 = vector.load %arg3[%c0_6, %c0_7] : memref<128x128xbf16, #tpu.memory_space<vmem>>, vector<128x128xbf16>
    %cst_8 = arith.constant dense<0.000000e+00> : vector<8x128xf32>
    %10 = tpu.matmul %8, %9, %cst_8 {dimension_numbers = #tpu.dot_dimension_numbers<[1], [0], [0], [1], [0, 0, 1, 1], [], []>} : vector<8x128xbf16>, vector<128x128xbf16>, vector<8x128xf32> -> vector<8x128xf32>
    %c0_9 = arith.constant 0 : index
    %c0_10 = arith.constant 0 : index
    %11 = vector.load %arg4[%c0_9, %c0_10] : memref<1x128xf32, #tpu.memory_space<vmem>>, vector<1x128xf32>
    %12 = vector.broadcast %11 : vector<1x128xf32> to vector<8x128xf32>
    %13 = arith.addf %10, %12 : vector<8x128xf32>
    %14 = tpu.iota {dimensions = array<i32: 1>} : vector<8x128xi32>
    %c0_11 = arith.constant 0 : index
    %c0_12 = arith.constant 0 : index
    %15 = vector.load %arg5[%c0_11, %c0_12] : memref<8x128xf32, #tpu.memory_space<vmem>>, vector<8x128xf32>
    %c0_13 = arith.constant 0 : index
    %c0_14 = arith.constant 0 : index
    %16 = vector.load %arg6[%c0_13, %c0_14] : memref<8x1xf32, #tpu.memory_space<vmem>>, vector<8x1xf32>
    %c0_i32 = arith.constant 0 : i32
    %17 = vector.broadcast %c0_i32 : i32 to vector<8x128xi32>
    %18 = arith.cmpi sge, %14, %17 : vector<8x128xi32>
    %c10_i32 = arith.constant 10 : i32
    %19 = vector.broadcast %c10_i32 : i32 to vector<8x128xi32>
    %20 = arith.cmpi slt, %14, %19 : vector<8x128xi32>
    %21 = arith.andi %18, %20 : vector<8x128xi1>
    %cst_15 = arith.constant 0xFF800000 : f32
    %22 = vector.broadcast %cst_15 : f32 to vector<8x128xf32>
    %23 = arith.select %21, %13, %22 : vector<8x128xi1>, vector<8x128xf32>
    %cst_16 = arith.constant dense<0xFF800000> : vector<8xf32>
    %24 = vector.multi_reduction <maximumf>, %23, %cst_16 [1] : vector<8x128xf32> to vector<8xf32>
    %25 = vector.shape_cast %24 : vector<8xf32> to vector<8x1xf32>
    %26 = vector.broadcast %25 : vector<8x1xf32> to vector<8x128xf32>
    %27 = arith.subf %23, %26 : vector<8x128xf32>
    %28 = math.exp %27 : vector<8x128xf32>
    %cst_17 = arith.constant dense<0.000000e+00> : vector<8xf32>
    %29 = vector.multi_reduction <add>, %28, %cst_17 [1] : vector<8x128xf32> to vector<8xf32>
    %30 = vector.shape_cast %29 : vector<8xf32> to vector<8x1xf32>
    %31 = math.log %30 : vector<8x1xf32>
    %32 = arith.addf %31, %25 : vector<8x1xf32>
    %33 = arith.mulf %15, %13 : vector<8x128xf32>
    %cst_18 = arith.constant 0.000000e+00 : f32
    %34 = vector.broadcast %cst_18 : f32 to vector<8x128xf32>
    %35 = arith.select %21, %33, %34 : vector<8x128xi1>, vector<8x128xf32>
    %cst_19 = arith.constant dense<0.000000e+00> : vector<8xf32>
    %36 = vector.multi_reduction <add>, %35, %cst_19 [1] : vector<8x128xf32> to vector<8xf32>
    %37 = vector.shape_cast %36 : vector<8xf32> to vector<8x1xf32>
    %38 = arith.subf %32, %37 : vector<8x1xf32>
    %39 = arith.mulf %38, %16 : vector<8x1xf32>
    %cst_20 = arith.constant dense<0.000000e+00> : vector<1xf32>
    %40 = vector.multi_reduction <add>, %39, %cst_20 [0] : vector<8x1xf32> to vector<1xf32>
    %41 = vector.shape_cast %40 : vector<1xf32> to vector<1x1xf32>
    %c10_i32_21 = arith.constant 10 : i32
    %42 = vector.broadcast %c10_i32_21 : i32 to vector<8x128xi32>
    %43 = arith.cmpi sge, %14, %42 : vector<8x128xi32>
    %c20_i32 = arith.constant 20 : i32
    %44 = vector.broadcast %c20_i32 : i32 to vector<8x128xi32>
    %45 = arith.cmpi slt, %14, %44 : vector<8x128xi32>
    %46 = arith.andi %43, %45 : vector<8x128xi1>
    %cst_22 = arith.constant 0xFF800000 : f32
    %47 = vector.broadcast %cst_22 : f32 to vector<8x128xf32>
    %48 = arith.select %46, %13, %47 : vector<8x128xi1>, vector<8x128xf32>
    %cst_23 = arith.constant dense<0xFF800000> : vector<8xf32>
    %49 = vector.multi_reduction <maximumf>, %48, %cst_23 [1] : vector<8x128xf32> to vector<8xf32>
    %50 = vector.shape_cast %49 : vector<8xf32> to vector<8x1xf32>
    %51 = vector.broadcast %50 : vector<8x1xf32> to vector<8x128xf32>
    %52 = arith.subf %48, %51 : vector<8x128xf32>
    %53 = math.exp %52 : vector<8x128xf32>
    %cst_24 = arith.constant dense<0.000000e+00> : vector<8xf32>
    %54 = vector.multi_reduction <add>, %53, %cst_24 [1] : vector<8x128xf32> to vector<8xf32>
    %55 = vector.shape_cast %54 : vector<8xf32> to vector<8x1xf32>
    %56 = math.log %55 : vector<8x1xf32>
    %57 = arith.addf %56, %50 : vector<8x1xf32>
    %58 = arith.mulf %15, %13 : vector<8x128xf32>
    %cst_25 = arith.constant 0.000000e+00 : f32
    %59 = vector.broadcast %cst_25 : f32 to vector<8x128xf32>
    %60 = arith.select %46, %58, %59 : vector<8x128xi1>, vector<8x128xf32>
    %cst_26 = arith.constant dense<0.000000e+00> : vector<8xf32>
    %61 = vector.multi_reduction <add>, %60, %cst_26 [1] : vector<8x128xf32> to vector<8xf32>
    %62 = vector.shape_cast %61 : vector<8xf32> to vector<8x1xf32>
    %63 = arith.subf %57, %62 : vector<8x1xf32>
    %64 = arith.mulf %63, %16 : vector<8x1xf32>
    %cst_27 = arith.constant dense<0.000000e+00> : vector<1xf32>
    %65 = vector.multi_reduction <add>, %64, %cst_27 [0] : vector<8x1xf32> to vector<1xf32>
    %66 = vector.shape_cast %65 : vector<1xf32> to vector<1x1xf32>
    %67 = tpu.concatenate %41, %66 in 1 : vector<1x1xf32>, vector<1x1xf32> -> vector<1x2xf32>
    %c0_28 = arith.constant 0 : index
    %c0_29 = arith.constant 0 : index
    %68 = vector.load %arg7[%c0_28, %c0_29] : memref<1x2xf32, #tpu.memory_space<vmem>>, vector<1x2xf32>
    tpu.vector_store %arg7[%c0_28, %c0_29], %67 {strides = array<i32>} : memref<1x2xf32, #tpu.memory_space<vmem>>, vector<1x2xf32>,
    return
  }
}

</mosaic_0001>

<bundles_post_ra>
// kernel: regression_train_forward.3
= control target key start
LH: loop header
LB: loop body
LE: loop exit
PB: predicated region body
PF: predicated region fallthrough
CT: control target
= control target key end

     0   :  { %s1310_s12 = smov 0   ;;  %s1550_s0 = inlined_call_operand.vmem [shape: bf16[3584,81], index: 0, kind: input, shape index: {}]   ;;  %s1551_s1 = inlined_call_operand.vmem [shape: bf16[81,128], index: 1, kind: input, shape index: {}]   ;;  %s1552_s2 = inlined_call_operand.vmem [shape: f32[1,128], index: 2, kind: input, shape index: {}]   ;;  %s1553_s3 = inlined_call_operand.vmem [shape: f32[3584,128], index: 3, kind: output, shape index: {}]  }
   0x1 LB: > { %s1026_s13 = sadd.s32 4294967295, %s1287_s12   ;;  %p1030_p0 = scmp.ge.s32.totalorder %s1287_s12, 1  ;;  %s1287_s12 = sphi %s1310_s12, %s13_s12  }
   0x2   : > { %p138_p1 = scmp.lt.s32.totalorder %s1287_s12, 8 }
   0x4   : > { %p139_p2 = pnand %p1030_p0, %p138_p1 }
   0x5   : > { %v1243_v0 = vld [vmem:[%s1551_s1] sm:$0xff] (!%p139_p2)   ;;  %v1244_v1 = vld [vmem:[%s1551_s1 + $0x8] sm:$0xff] (!%p139_p2)   ;;  %s1031_s18 = sshll.u32 (!%p139_p2), %s1026_s13, 6  ;;  %v1245_v2 = vld [vmem:[%s1551_s1 + $0x10] sm:$0xff] (!%p139_p2)   ;;  %vm547_vm0 = vcmask (!%p139_p2), 1040384   ;;  %vm450_vm1 = vcmask (!%p139_p2), 662528  }
   0x6   : > { %142 = sbr.rel (%p139_p2) target bundleno = 306 (0x132), region = 32  ;;  %1146 = vmatprep.subr.bf16.mxu0 (!%p139_p2), %v1243_v0  ;;  %1222 = vmatprep.subr.bf16.mxu1 (!%p139_p2), %v1243_v0  ;;  %p163_p3 = scmp.lt.s32.totalorder (!%p139_p2), %s1031_s18, 447  ;;  %v1246_v3 = vld [vmem:[%s1551_s1 + $0x18] sm:$0xff] (!%p139_p2)   ;;  %v1248_v4 = vld [vmem:[%s1551_s1 + $0x28] ss:$0 sps:$4 sm:$0x11] (!%p139_p2)  }
   0x7   : > { %1147 = vmatpush3.bf16.msra.mxu0 (!%p139_p2), %v1243_v0  ;;  %1228 = vmatpush3.bf16.msra.mxu1 (!%p139_p2), %v1243_v0  ;;  %v1247_v7 = vld [vmem:[%s1551_s1 + $0x20] sm:$0xff] (!%p139_p2)   ;;  %v1289_v8 = vmov (!%p139_p2), 0  }
   0x8   : > { %1148 = vmatprep.subr.bf16.mxu0 (!%p139_p2), %v1244_v1  ;;  %1223 = vmatprep.subr.bf16.mxu1 (!%p139_p2), %v1244_v1  ;;  %v549_v9 = vsel (!%p139_p2), %vm547_vm0, 65535, %v1289_v8  ;;  %v1411_v41 = vld [vmem:[%s1552_s2] ss:$0 sm:$0xff] (!%p139_p2) }
   0x9   : > { %v551_v10 = vand.u32 (!%p139_p2), %v1248_v4, %v549_v9 }
   0xb   : > { %1149 = vmatpush3.bf16.msra.mxu0 (!%p139_p2), %v1244_v1  ;;  %1229 = vmatpush3.bf16.msra.mxu1 (!%p139_p2), %v1244_v1 }
   0xc   : > { %1150 = vmatprep.subr.bf16.mxu0 (!%p139_p2), %v1245_v2  ;;  %1224 = vmatprep.subr.bf16.mxu1 (!%p139_p2), %v1245_v2 }
   0xd   : > { %s1555_s18 = smov (!%p163_p3, %s1031_s18), 447 }
   0xe   : > { %s1032_s23 = sshll.u32 %s1555_s18, 2  ;;  %s1034_s6 = sshll.u32 %s1555_s18, 3 }
   0xf   : > { %s1336_s26 = scalar_lea.vmem %s1550_s0, %s1032_s23  ;;  %1151 = vmatpush3.bf16.msra.mxu0 %v1245_v2  ;;  %1230 = vmatpush3.bf16.msra.mxu1 %v1245_v2  ;;  %s1419_s9 = scalar_lea.vmem %s1553_s3, %s1034_s6 }
  0x10   : > { %v1249_v5 = vld [vmem:[%s1336_s26] sm:$0xff]   ;;  %1152 = vmatprep.subr.bf16.mxu0 %v1246_v3  ;;  %1225 = vmatprep.subr.bf16.mxu1 %v1246_v3  ;;  %v1251_v11 = vld [vmem:[%s1336_s26 + $0x8] sm:$0xff]   ;;  %v1253_v13 = vld [vmem:[%s1336_s26 + $0x10] sm:$0xff]  }
  0x11   : > { %v1250_v6 = vld [vmem:[%s1336_s26 + $0x80] sm:$0xff]   ;;  %1158 = vmatprep.mubr.msk.bf16.mxu0 %vm450_vm1, %v1249_v5  ;;  %v1252_v12 = vld [vmem:[%s1336_s26 + $0x88] sm:$0xff]   ;;  %v1254_v14 = vld [vmem:[%s1336_s26 + $0x90] sm:$0xff]  }
  0x12   : > { %1190 = vmatprep.mubr.msk.bf16.mxu1 %vm450_vm1, %v1250_v6  ;;  %v1255_v15 = vld [vmem:[%s1336_s26 + $0x18] sm:$0xff]   ;;  %v1257_v17 = vld [vmem:[%s1336_s26 + $0x20] sm:$0xff]   ;;  %v1259_v19 = vld [vmem:[%s1336_s26 + $0x28] sm:$0xff]  }
  0x13   : > { %1153 = vmatpush3.bf16.msra.mxu0 %v1246_v3  ;;  %1231 = vmatpush3.bf16.msra.mxu1 %v1246_v3  ;;  %v1256_v16 = vld [vmem:[%s1336_s26 + $0x98] sm:$0xff]   ;;  %v1258_v18 = vld [vmem:[%s1336_s26 + $0xa0] sm:$0xff]   ;;  %v1260_v20 = vld [vmem:[%s1336_s26 + $0xa8] sm:$0xff]  }
  0x14   : > { %1154 = vmatprep.subr.bf16.mxu0 %v1247_v7  ;;  %1226 = vmatprep.subr.bf16.mxu1 %v1247_v7  ;;  %v1261_v21 = vld [vmem:[%s1336_s26 + $0x30] sm:$0xff]   ;;  %v1263_v23 = vld [vmem:[%s1336_s26 + $0x38] sm:$0xff]   ;;  %v1265_v25 = vld [vmem:[%s1336_s26 + $0x40] sm:$0xff]  }
  0x15   : > { %v1262_v22 = vld [vmem:[%s1336_s26 + $0xb0] sm:$0xff]   ;;  %v1264_v24 = vld [vmem:[%s1336_s26 + $0xb8] sm:$0xff]   ;;  %v1266_v26 = vld [vmem:[%s1336_s26 + $0xc0] sm:$0xff]  }
  0x16   : > { %v1267_v27 = vld [vmem:[%s1336_s26 + $0x48] sm:$0xff]   ;;  %v1269_v29 = vld [vmem:[%s1336_s26 + $0x50] sm:$0xff]   ;;  %v1271_v31 = vld [vmem:[%s1336_s26 + $0x58] sm:$0xff]  }
  0x17   : > { %1155 = vmatpush3.bf16.msra.mxu0 %v1247_v7  ;;  %1232 = vmatpush3.bf16.msra.mxu1 %v1247_v7  ;;  %v1268_v28 = vld [vmem:[%s1336_s26 + $0xc8] sm:$0xff]   ;;  %v1270_v30 = vld [vmem:[%s1336_s26 + $0xd0] sm:$0xff]   ;;  %v1272_v32 = vld [vmem:[%s1336_s26 + $0xd8] sm:$0xff]  }
  0x18   : > { %1156 = vmatprep.subr.bf16.mxu0 %v551_v10  ;;  %1227 = vmatprep.subr.bf16.mxu1 %v551_v10  ;;  %v1273_v33 = vld [vmem:[%s1336_s26 + $0x60] sm:$0xff]   ;;  %v1275_v35 = vld [vmem:[%s1336_s26 + $0x68] sm:$0xff]   ;;  %v1277_v37 = vld [vmem:[%s1336_s26 + $0x70] sm:$0xff]  }
  0x19   : > { %v1274_v34 = vld [vmem:[%s1336_s26 + $0xe0] sm:$0xff]   ;;  %v1276_v36 = vld [vmem:[%s1336_s26 + $0xe8] sm:$0xff]   ;;  %v1278_v38 = vld [vmem:[%s1336_s26 + $0xf0] sm:$0xff]  }
  0x1a   : > { %v1279_v39 = vld [vmem:[%s1336_s26 + $0x78] sm:$0xff]  }
  0x1b   : > { %1157 = vmatpush3.bf16.msra.mxu0 %v551_v10  ;;  %1233 = vmatpush3.bf16.msra.mxu1 %v551_v10  ;;  %v1280_v40 = vld [vmem:[%s1336_s26 + $0xf8] sm:$0xff]  }
  0x1e   : > { %1159 = vmatmul.mubr.msk.bf16.vlgmr.msra.gmra.mrb[0].mxu0 %vm450_vm1, %v1251_v11  ;;  %1191 = vmatmul.mubr.msk.bf16.vlgmr.msra.gmra.mrb[0].mxu1 %vm450_vm1, %v1252_v12 }
  0x1f   : > { %1162 = vmatprep.mubr.msk.bf16.mxu0 %vm450_vm1, %v1253_v13  ;;  %1194 = vmatprep.mubr.msk.bf16.mxu1 %vm450_vm1, %v1254_v14 }
  0x26   : > { %1163 = vmatmul.mubr.msk.bf16.gmra.mrb[4].mxu0 %vm450_vm1, %v1255_v15  ;;  %1195 = vmatmul.mubr.msk.bf16.gmra.mrb[4].mxu1 %vm450_vm1, %v1256_v16 }
  0x27   : > { %1166 = vmatprep.mubr.msk.bf16.mxu0 %vm450_vm1, %v1257_v17  ;;  %1198 = vmatprep.mubr.msk.bf16.mxu1 %vm450_vm1, %v1258_v18 }
  0x2e   : > { %1167 = vmatmul.mubr.msk.bf16.gmra.mrb[8].mxu0 %vm450_vm1, %v1259_v19  ;;  %1199 = vmatmul.mubr.msk.bf16.gmra.mrb[8].mxu1 %vm450_vm1, %v1260_v20 }
  0x2f   : > { %1170 = vmatprep.mubr.msk.bf16.mxu0 %vm450_vm1, %v1261_v21  ;;  %1202 = vmatprep.mubr.msk.bf16.mxu1 %vm450_vm1, %v1262_v22 }
  0x36   : > { %1171 = vmatmul.mubr.msk.bf16.gmra.mrb[12].mxu0 %vm450_vm1, %v1263_v23  ;;  %1203 = vmatmul.mubr.msk.bf16.gmra.mrb[12].mxu1 %vm450_vm1, %v1264_v24 }
  0x37   : > { %1174 = vmatprep.mubr.msk.bf16.mxu0 %vm450_vm1, %v1265_v25  ;;  %1206 = vmatprep.mubr.msk.bf16.mxu1 %vm450_vm1, %v1266_v26 }
  0x3e   : > { %1175 = vmatmul.mubr.msk.bf16.gmra.mrb[16].mxu0 %vm450_vm1, %v1267_v27  ;;  %1207 = vmatmul.mubr.msk.bf16.gmra.mrb[16].mxu1 %vm450_vm1, %v1268_v28 }
  0x3f   : > { %1178 = vmatprep.mubr.msk.bf16.mxu0 %vm450_vm1, %v1269_v29  ;;  %1210 = vmatprep.mubr.msk.bf16.mxu1 %vm450_vm1, %v1270_v30 }
  0x46   : > { %1179 = vmatmul.mubr.msk.bf16.gmra.mrb[20].mxu0 %vm450_vm1, %v1271_v31  ;;  %1211 = vmatmul.mubr.msk.bf16.gmra.mrb[20].mxu1 %vm450_vm1, %v1272_v32 }
  0x47   : > { %1182 = vmatprep.mubr.msk.bf16.mxu0 %vm450_vm1, %v1273_v33  ;;  %1214 = vmatprep.mubr.msk.bf16.mxu1 %vm450_vm1, %v1274_v34 }
  0x4e   : > { %1183 = vmatmul.mubr.msk.bf16.gmra.mrb[24].mxu0 %vm450_vm1, %v1275_v35  ;;  %1215 = vmatmul.mubr.msk.bf16.gmra.mrb[24].mxu1 %vm450_vm1, %v1276_v36 }
  0x4f   : > { %1186 = vmatprep.mubr.msk.bf16.mxu0 %vm450_vm1, %v1277_v37  ;;  %1218 = vmatprep.mubr.msk.bf16.mxu1 %vm450_vm1, %v1278_v38 }
  0x56   : > { %1187 = vmatmul.mubr.msk.bf16.gmra.mrb[28].mxu0 %vm450_vm1, %v1279_v39  ;;  %1219 = vmatmul.mubr.msk.bf16.gmra.mrb[28].mxu1 %vm450_vm1, %v1280_v40 }
  0xf1   : > { %v1160_v42 = vpop.f32.mrb[0].mxu0  ;;  %v1192_v43 = vpop.f32.mrb[0].mxu1 }
  0xf2   : > { %v596_v44 = vadd.f32 %v1160_v42, %v1411_v41  ;;  %v724_v45 = vadd.f32 %v1192_v43, %v1411_v41  ;;  %v587_v46 = vpop.f32.mrb[1].mxu0  ;;  %v715_v47 = vpop.f32.mrb[1].mxu1 }
  0xf3   : > { %v588_v48 = vadd.f32 %v1411_v41, %v587_v46  ;;  %v716_v49 = vadd.f32 %v1411_v41, %v715_v47  ;;  %v1161_v50 = vpop.f32.mrb[2].mxu0  ;;  %v1193_v51 = vpop.f32.mrb[2].mxu1 }
  0xf4   : > { %v844_v52 = vmax.f32 %v596_v44, 0.0  ;;  %v876_v53 = vmax.f32 %v724_v45, 0.0  ;;  %v599_v54 = vadd.f32 %v1161_v50, %v1411_v41  ;;  %v727_v55 = vadd.f32 %v1193_v51, %v1411_v41  ;;  %v590_v56 = vpop.f32.mrb[3].mxu0  ;;  %v718_v57 = vpop.f32.mrb[3].mxu1 }
  0xf5   : > { %v842_v58 = vmax.f32 %v588_v48, 0.0  ;;  %v874_v59 = vmax.f32 %v716_v49, 0.0  ;;  %v591_v60 = vadd.f32 %v1411_v41, %v590_v56  ;;  %v719_v61 = vadd.f32 %v1411_v41, %v718_v57 }
  0xf6   : > { %908 = vst [vmem:[%s1419_s9 + $0x10] sm:$0xff] %v844_v52  ;;  %940 = vst [vmem:[%s1419_s9 + $0x110] sm:$0xff] %v876_v53  ;;  %v845_v62 = vmax.f32 %v599_v54, 0.0  ;;  %v877_v63 = vmax.f32 %v727_v55, 0.0 }
  0xf7   : > { %906 = vst [vmem:[%s1419_s9] sm:$0xff] %v842_v58  ;;  %938 = vst [vmem:[%s1419_s9 + $0x100] sm:$0xff] %v874_v59  ;;  %v843_v0 = vmax.f32 %v591_v60, 0.0  ;;  %v875_v1 = vmax.f32 %v719_v61, 0.0 }
  0xf8   : > { %909 = vst [vmem:[%s1419_s9 + $0x18] sm:$0xff] %v845_v62  ;;  %941 = vst [vmem:[%s1419_s9 + $0x118] sm:$0xff] %v877_v63 }
  0xf9   : > { %907 = vst [vmem:[%s1419_s9 + $0x8] sm:$0xff] %v843_v0  ;;  %939 = vst [vmem:[%s1419_s9 + $0x108] sm:$0xff] %v875_v1  ;;  %v1164_v2 = vpop.f32.mrb[4].mxu0  ;;  %v1196_v3 = vpop.f32.mrb[4].mxu1 }
  0xfa   : > { %v612_v4 = vadd.f32 %v1164_v2, %v1411_v41  ;;  %v740_v5 = vadd.f32 %v1196_v3, %v1411_v41  ;;  %v603_v6 = vpop.f32.mrb[5].mxu0  ;;  %v731_v7 = vpop.f32.mrb[5].mxu1 }
  0xfb   : > { %v604_v8 = vadd.f32 %v1411_v41, %v603_v6  ;;  %v732_v9 = vadd.f32 %v1411_v41, %v731_v7  ;;  %v1165_v10 = vpop.f32.mrb[6].mxu0  ;;  %v1197_v11 = vpop.f32.mrb[6].mxu1 }
  0xfc   : > { %v848_v12 = vmax.f32 %v612_v4, 0.0  ;;  %v880_v13 = vmax.f32 %v740_v5, 0.0  ;;  %v615_v14 = vadd.f32 %v1165_v10, %v1411_v41  ;;  %v743_v15 = vadd.f32 %v1197_v11, %v1411_v41  ;;  %v606_v16 = vpop.f32.mrb[7].mxu0  ;;  %v734_v17 = vpop.f32.mrb[7].mxu1 }
  0xfd   : > { %v846_v18 = vmax.f32 %v604_v8, 0.0  ;;  %v878_v19 = vmax.f32 %v732_v9, 0.0  ;;  %v607_v20 = vadd.f32 %v1411_v41, %v606_v16  ;;  %v735_v21 = vadd.f32 %v1411_v41, %v734_v17 }
  0xfe   : > { %912 = vst [vmem:[%s1419_s9 + $0x30] sm:$0xff] %v848_v12  ;;  %944 = vst [vmem:[%s1419_s9 + $0x130] sm:$0xff] %v880_v13  ;;  %v849_v22 = vmax.f32 %v615_v14, 0.0  ;;  %v881_v23 = vmax.f32 %v743_v15, 0.0 }
  0xff   : > { %910 = vst [vmem:[%s1419_s9 + $0x20] sm:$0xff] %v846_v18  ;;  %942 = vst [vmem:[%s1419_s9 + $0x120] sm:$0xff] %v878_v19  ;;  %v847_v24 = vmax.f32 %v607_v20, 0.0  ;;  %v879_v25 = vmax.f32 %v735_v21, 0.0 }
 0x100   : > { %913 = vst [vmem:[%s1419_s9 + $0x38] sm:$0xff] %v849_v22  ;;  %945 = vst [vmem:[%s1419_s9 + $0x138] sm:$0xff] %v881_v23 }
 0x101   : > { %911 = vst [vmem:[%s1419_s9 + $0x28] sm:$0xff] %v847_v24  ;;  %943 = vst [vmem:[%s1419_s9 + $0x128] sm:$0xff] %v879_v25  ;;  %v1168_v26 = vpop.f32.mrb[8].mxu0  ;;  %v1200_v27 = vpop.f32.mrb[8].mxu1 }
 0x102   : > { %v628_v28 = vadd.f32 %v1168_v26, %v1411_v41  ;;  %v756_v29 = vadd.f32 %v1200_v27, %v1411_v41  ;;  %v619_v30 = vpop.f32.mrb[9].mxu0  ;;  %v747_v31 = vpop.f32.mrb[9].mxu1 }
 0x103   : > { %v620_v32 = vadd.f32 %v1411_v41, %v619_v30  ;;  %v748_v33 = vadd.f32 %v1411_v41, %v747_v31  ;;  %v1169_v34 = vpop.f32.mrb[10].mxu0  ;;  %v1201_v35 = vpop.f32.mrb[10].mxu1 }
 0x104   : > { %v852_v36 = vmax.f32 %v628_v28, 0.0  ;;  %v884_v37 = vmax.f32 %v756_v29, 0.0  ;;  %v631_v38 = vadd.f32 %v1169_v34, %v1411_v41  ;;  %v759_v39 = vadd.f32 %v1201_v35, %v1411_v41  ;;  %v622_v40 = vpop.f32.mrb[11].mxu0  ;;  %v750_v42 = vpop.f32.mrb[11].mxu1 }
 0x105   : > { %v850_v43 = vmax.f32 %v620_v32, 0.0  ;;  %v882_v44 = vmax.f32 %v748_v33, 0.0  ;;  %v623_v45 = vadd.f32 %v1411_v41, %v622_v40  ;;  %v751_v46 = vadd.f32 %v1411_v41, %v750_v42 }
 0x106   : > { %916 = vst [vmem:[%s1419_s9 + $0x50] sm:$0xff] %v852_v36  ;;  %948 = vst [vmem:[%s1419_s9 + $0x150] sm:$0xff] %v884_v37  ;;  %v853_v47 = vmax.f32 %v631_v38, 0.0  ;;  %v885_v48 = vmax.f32 %v759_v39, 0.0 }
 0x107   : > { %914 = vst [vmem:[%s1419_s9 + $0x40] sm:$0xff] %v850_v43  ;;  %946 = vst [vmem:[%s1419_s9 + $0x140] sm:$0xff] %v882_v44  ;;  %v851_v49 = vmax.f32 %v623_v45, 0.0  ;;  %v883_v50 = vmax.f32 %v751_v46, 0.0 }
 0x108   : > { %917 = vst [vmem:[%s1419_s9 + $0x58] sm:$0xff] %v853_v47  ;;  %949 = vst [vmem:[%s1419_s9 + $0x158] sm:$0xff] %v885_v48 }
 0x109   : > { %915 = vst [vmem:[%s1419_s9 + $0x48] sm:$0xff] %v851_v49  ;;  %947 = vst [vmem:[%s1419_s9 + $0x148] sm:$0xff] %v883_v50  ;;  %v1172_v51 = vpop.f32.mrb[12].mxu0  ;;  %v1204_v52 = vpop.f32.mrb[12].mxu1 }
 0x10a   : > { %v644_v53 = vadd.f32 %v1172_v51, %v1411_v41  ;;  %v772_v54 = vadd.f32 %v1204_v52, %v1411_v41  ;;  %v635_v55 = vpop.f32.mrb[13].mxu0  ;;  %v763_v56 = vpop.f32.mrb[13].mxu1 }
 0x10b   : > { %v636_v57 = vadd.f32 %v1411_v41, %v635_v55  ;;  %v764_v58 = vadd.f32 %v1411_v41, %v763_v56  ;;  %v1173_v59 = vpop.f32.mrb[14].mxu0  ;;  %v1205_v60 = vpop.f32.mrb[14].mxu1 }
 0x10c   : > { %v856_v61 = vmax.f32 %v644_v53, 0.0  ;;  %v888_v62 = vmax.f32 %v772_v54, 0.0  ;;  %v647_v63 = vadd.f32 %v1173_v59, %v1411_v41  ;;  %v775_v0 = vadd.f32 %v1205_v60, %v1411_v41  ;;  %v638_v1 = vpop.f32.mrb[15].mxu0  ;;  %v766_v2 = vpop.f32.mrb[15].mxu1 }
 0x10d   : > { %v854_v3 = vmax.f32 %v636_v57, 0.0  ;;  %v886_v4 = vmax.f32 %v764_v58, 0.0  ;;  %v639_v5 = vadd.f32 %v1411_v41, %v638_v1  ;;  %v767_v6 = vadd.f32 %v1411_v41, %v766_v2 }
 0x10e   : > { %920 = vst [vmem:[%s1419_s9 + $0x70] sm:$0xff] %v856_v61  ;;  %952 = vst [vmem:[%s1419_s9 + $0x170] sm:$0xff] %v888_v62  ;;  %v857_v7 = vmax.f32 %v647_v63, 0.0  ;;  %v889_v8 = vmax.f32 %v775_v0, 0.0 }
 0x10f   : > { %918 = vst [vmem:[%s1419_s9 + $0x60] sm:$0xff] %v854_v3  ;;  %950 = vst [vmem:[%s1419_s9 + $0x160] sm:$0xff] %v886_v4  ;;  %v855_v9 = vmax.f32 %v639_v5, 0.0  ;;  %v887_v10 = vmax.f32 %v767_v6, 0.0 }
 0x110   : > { %921 = vst [vmem:[%s1419_s9 + $0x78] sm:$0xff] %v857_v7  ;;  %953 = vst [vmem:[%s1419_s9 + $0x178] sm:$0xff] %v889_v8 }
 0x111   : > { %919 = vst [vmem:[%s1419_s9 + $0x68] sm:$0xff] %v855_v9  ;;  %951 = vst [vmem:[%s1419_s9 + $0x168] sm:$0xff] %v887_v10  ;;  %v1176_v11 = vpop.f32.mrb[16].mxu0  ;;  %v1208_v12 = vpop.f32.mrb[16].mxu1 }
 0x112   : > { %v660_v13 = vadd.f32 %v1176_v11, %v1411_v41  ;;  %v788_v14 = vadd.f32 %v1208_v12, %v1411_v41  ;;  %v651_v15 = vpop.f32.mrb[17].mxu0  ;;  %v779_v16 = vpop.f32.mrb[17].mxu1 }
 0x113   : > { %v652_v17 = vadd.f32 %v1411_v41, %v651_v15  ;;  %v780_v18 = vadd.f32 %v1411_v41, %v779_v16  ;;  %v1177_v19 = vpop.f32.mrb[18].mxu0  ;;  %v1209_v20 = vpop.f32.mrb[18].mxu1 }
 0x114   : > { %v860_v21 = vmax.f32 %v660_v13, 0.0  ;;  %v892_v22 = vmax.f32 %v788_v14, 0.0  ;;  %v663_v23 = vadd.f32 %v1177_v19, %v1411_v41  ;;  %v791_v24 = vadd.f32 %v1209_v20, %v1411_v41  ;;  %v654_v25 = vpop.f32.mrb[19].mxu0  ;;  %v782_v26 = vpop.f32.mrb[19].mxu1 }
 0x115   : > { %v858_v27 = vmax.f32 %v652_v17, 0.0  ;;  %v890_v28 = vmax.f32 %v780_v18, 0.0  ;;  %v655_v29 = vadd.f32 %v1411_v41, %v654_v25  ;;  %v783_v30 = vadd.f32 %v1411_v41, %v782_v26 }
 0x116   : > { %924 = vst [vmem:[%s1419_s9 + $0x90] sm:$0xff] %v860_v21  ;;  %956 = vst [vmem:[%s1419_s9 + $0x190] sm:$0xff] %v892_v22  ;;  %v861_v31 = vmax.f32 %v663_v23, 0.0  ;;  %v893_v32 = vmax.f32 %v791_v24, 0.0 }
 0x117   : > { %922 = vst [vmem:[%s1419_s9 + $0x80] sm:$0xff] %v858_v27  ;;  %954 = vst [vmem:[%s1419_s9 + $0x180] sm:$0xff] %v890_v28  ;;  %v859_v33 = vmax.f32 %v655_v29, 0.0  ;;  %v891_v34 = vmax.f32 %v783_v30, 0.0 }
 0x118   : > { %925 = vst [vmem:[%s1419_s9 + $0x98] sm:$0xff] %v861_v31  ;;  %957 = vst [vmem:[%s1419_s9 + $0x198] sm:$0xff] %v893_v32 }
 0x119   : > { %923 = vst [vmem:[%s1419_s9 + $0x88] sm:$0xff] %v859_v33  ;;  %955 = vst [vmem:[%s1419_s9 + $0x188] sm:$0xff] %v891_v34  ;;  %v1180_v35 = vpop.f32.mrb[20].mxu0  ;;  %v1212_v36 = vpop.f32.mrb[20].mxu1 }
 0x11a   : > { %v676_v37 = vadd.f32 %v1180_v35, %v1411_v41  ;;  %v804_v38 = vadd.f32 %v1212_v36, %v1411_v41  ;;  %v667_v39 = vpop.f32.mrb[21].mxu0  ;;  %v795_v40 = vpop.f32.mrb[21].mxu1 }
 0x11b   : > { %v668_v42 = vadd.f32 %v1411_v41, %v667_v39  ;;  %v796_v43 = vadd.f32 %v1411_v41, %v795_v40  ;;  %v1181_v44 = vpop.f32.mrb[22].mxu0  ;;  %v1213_v45 = vpop.f32.mrb[22].mxu1 }
 0x11c   : > { %v864_v46 = vmax.f32 %v676_v37, 0.0  ;;  %v896_v47 = vmax.f32 %v804_v38, 0.0  ;;  %v679_v48 = vadd.f32 %v1181_v44, %v1411_v41  ;;  %v807_v49 = vadd.f32 %v1213_v45, %v1411_v41  ;;  %v670_v50 = vpop.f32.mrb[23].mxu0  ;;  %v798_v51 = vpop.f32.mrb[23].mxu1 }
 0x11d   : > { %v862_v52 = vmax.f32 %v668_v42, 0.0  ;;  %v894_v53 = vmax.f32 %v796_v43, 0.0  ;;  %v671_v54 = vadd.f32 %v1411_v41, %v670_v50  ;;  %v799_v55 = vadd.f32 %v1411_v41, %v798_v51 }
 0x11e   : > { %928 = vst [vmem:[%s1419_s9 + $0xb0] sm:$0xff] %v864_v46  ;;  %960 = vst [vmem:[%s1419_s9 + $0x1b0] sm:$0xff] %v896_v47  ;;  %v865_v56 = vmax.f32 %v679_v48, 0.0  ;;  %v897_v57 = vmax.f32 %v807_v49, 0.0 }
 0x11f   : > { %926 = vst [vmem:[%s1419_s9 + $0xa0] sm:$0xff] %v862_v52  ;;  %958 = vst [vmem:[%s1419_s9 + $0x1a0] sm:$0xff] %v894_v53  ;;  %v863_v58 = vmax.f32 %v671_v54, 0.0  ;;  %v895_v59 = vmax.f32 %v799_v55, 0.0 }
 0x120   : > { %929 = vst [vmem:[%s1419_s9 + $0xb8] sm:$0xff] %v865_v56  ;;  %961 = vst [vmem:[%s1419_s9 + $0x1b8] sm:$0xff] %v897_v57 }
 0x121   : > { %927 = vst [vmem:[%s1419_s9 + $0xa8] sm:$0xff] %v863_v58  ;;  %959 = vst [vmem:[%s1419_s9 + $0x1a8] sm:$0xff] %v895_v59  ;;  %v1184_v60 = vpop.f32.mrb[24].mxu0  ;;  %v1216_v61 = vpop.f32.mrb[24].mxu1 }
 0x122   : > { %v692_v62 = vadd.f32 %v1184_v60, %v1411_v41  ;;  %v820_v63 = vadd.f32 %v1216_v61, %v1411_v41  ;;  %v683_v0 = vpop.f32.mrb[25].mxu0  ;;  %v811_v1 = vpop.f32.mrb[25].mxu1 }
 0x123   : > { %v684_v2 = vadd.f32 %v1411_v41, %v683_v0  ;;  %v812_v3 = vadd.f32 %v1411_v41, %v811_v1  ;;  %v1185_v4 = vpop.f32.mrb[26].mxu0  ;;  %v1217_v5 = vpop.f32.mrb[26].mxu1 }
 0x124   : > { %v868_v6 = vmax.f32 %v692_v62, 0.0  ;;  %v900_v7 = vmax.f32 %v820_v63, 0.0  ;;  %v695_v8 = vadd.f32 %v1185_v4, %v1411_v41  ;;  %v823_v9 = vadd.f32 %v1217_v5, %v1411_v41  ;;  %v686_v10 = vpop.f32.mrb[27].mxu0  ;;  %v814_v11 = vpop.f32.mrb[27].mxu1 }
 0x125   : > { %v866_v12 = vmax.f32 %v684_v2, 0.0  ;;  %v898_v13 = vmax.f32 %v812_v3, 0.0  ;;  %v687_v14 = vadd.f32 %v1411_v41, %v686_v10  ;;  %v815_v15 = vadd.f32 %v1411_v41, %v814_v11 }
 0x126   : > { %932 = vst [vmem:[%s1419_s9 + $0xd0] sm:$0xff] %v868_v6  ;;  %964 = vst [vmem:[%s1419_s9 + $0x1d0] sm:$0xff] %v900_v7  ;;  %v869_v16 = vmax.f32 %v695_v8, 0.0  ;;  %v901_v17 = vmax.f32 %v823_v9, 0.0 }
 0x127   : > { %930 = vst [vmem:[%s1419_s9 + $0xc0] sm:$0xff] %v866_v12  ;;  %962 = vst [vmem:[%s1419_s9 + $0x1c0] sm:$0xff] %v898_v13  ;;  %v867_v18 = vmax.f32 %v687_v14, 0.0  ;;  %v899_v19 = vmax.f32 %v815_v15, 0.0 }
 0x128   : > { %933 = vst [vmem:[%s1419_s9 + $0xd8] sm:$0xff] %v869_v16  ;;  %965 = vst [vmem:[%s1419_s9 + $0x1d8] sm:$0xff] %v901_v17 }
 0x129   : > { %931 = vst [vmem:[%s1419_s9 + $0xc8] sm:$0xff] %v867_v18  ;;  %963 = vst [vmem:[%s1419_s9 + $0x1c8] sm:$0xff] %v899_v19  ;;  %v1188_v20 = vpop.f32.mrb[28].mxu0  ;;  %v1220_v21 = vpop.f32.mrb[28].mxu1 }
 0x12a   : > { %v708_v22 = vadd.f32 %v1188_v20, %v1411_v41  ;;  %v836_v23 = vadd.f32 %v1220_v21, %v1411_v41  ;;  %v699_v24 = vpop.f32.mrb[29].mxu0  ;;  %v827_v25 = vpop.f32.mrb[29].mxu1 }
 0x12b   : > { %v700_v26 = vadd.f32 %v1411_v41, %v699_v24  ;;  %v828_v27 = vadd.f32 %v1411_v41, %v827_v25  ;;  %v1189_v28 = vpop.f32.mrb[30].mxu0  ;;  %v1221_v29 = vpop.f32.mrb[30].mxu1 }
 0x12c   : > { %v872_v30 = vmax.f32 %v708_v22, 0.0  ;;  %v904_v31 = vmax.f32 %v836_v23, 0.0  ;;  %v711_v32 = vadd.f32 %v1189_v28, %v1411_v41  ;;  %v839_v33 = vadd.f32 %v1221_v29, %v1411_v41  ;;  %v702_v34 = vpop.f32.mrb[31].mxu0  ;;  %v830_v35 = vpop.f32.mrb[31].mxu1 }
 0x12d   : > { %v870_v36 = vmax.f32 %v700_v26, 0.0  ;;  %v902_v37 = vmax.f32 %v828_v27, 0.0  ;;  %v703_v38 = vadd.f32 %v1411_v41, %v702_v34  ;;  %v831_v39 = vadd.f32 %v1411_v41, %v830_v35 }
 0x12e   : > { %936 = vst [vmem:[%s1419_s9 + $0xf0] sm:$0xff] %v872_v30  ;;  %968 = vst [vmem:[%s1419_s9 + $0x1f0] sm:$0xff] %v904_v31  ;;  %v873_v40 = vmax.f32 %v711_v32, 0.0  ;;  %v905_v42 = vmax.f32 %v839_v33, 0.0 }
 0x12f   : > { %934 = vst [vmem:[%s1419_s9 + $0xe0] sm:$0xff] %v870_v36  ;;  %966 = vst [vmem:[%s1419_s9 + $0x1e0] sm:$0xff] %v902_v37  ;;  %v871_v43 = vmax.f32 %v703_v38, 0.0  ;;  %v903_v44 = vmax.f32 %v831_v39, 0.0 }
 0x130   : > { %937 = vst [vmem:[%s1419_s9 + $0xf8] sm:$0xff] %v873_v40  ;;  %969 = vst [vmem:[%s1419_s9 + $0x1f8] sm:$0xff] %v905_v42 }
 0x131   : > { %935 = vst [vmem:[%s1419_s9 + $0xe8] sm:$0xff] %v871_v43  ;;  %967 = vst [vmem:[%s1419_s9 + $0x1e8] sm:$0xff] %v903_v44 }
 0x132 PF: > { %s13_s12 = sadd.s32 1, %s1287_s12  }
 0x133   : > { %p10_p4 = scmp.ge.s32.totalorder %s13_s12, 9  }
 0x135   :  { %12 = sbr.rel (!%p10_p4) target bundleno = 1 (0x1), region = 62 }

// kernel: regression_train_forward.4
= control target key start
LH: loop header
LB: loop body
LE: loop exit
PB: predicated region body
PF: predicated region fallthrough
CT: control target
= control target key end

     0   :  { %v1057_v0 = vmov 0   ;;  %vm424_vm0 = vcmask 998400   ;;  %vm500_vm1 = vcmask 1044480   ;;  %s1538_s1 = inlined_call_operand.vmem [shape: bf16[250,128], index: 1, kind: input, shape index: {}]   ;;  %s1539_s0 = inlined_call_operand.vmem [shape: bf16[400,250], index: 0, kind: input, shape index: {}]   ;;  %s1540_s2 = inlined_call_operand.vmem [shape: f32[1,128], index: 2, kind: input, shape index: {}]   ;;  %s1541_s3 = inlined_call_operand.vmem [shape: f32[400,128], index: 3, kind: output, shape index: {}]  }
   0x1   :  { %504 = vmatprep.subr.bf16.mxu0 %v1057_v0  ;;  %v966_v1 = vld [vmem:[%s1538_s1] sm:$0xff]   ;;  %933 = vmatprep.subr.bf16.mxu1 %v1057_v0  ;;  %v967_v2 = vld [vmem:[%s1538_s1 + $0x8] sm:$0xff]   ;;  %v968_v3 = vld [vmem:[%s1538_s1 + $0x10] sm:$0xff]  }
   0x2   :  { %505 = vmatpush1.bf16.msra.mxu0 %v966_v1  ;;  %949 = vmatpush1.bf16.msra.mxu1 %v966_v1  ;;  %v969_v4 = vld [vmem:[%s1538_s1 + $0x18] sm:$0xff]   ;;  %v970_v5 = vld [vmem:[%s1538_s1 + $0x20] sm:$0xff]   ;;  %v971_v7 = vld [vmem:[%s1538_s1 + $0x28] sm:$0xff]  }
   0x3   :  { %506 = vmatprep.subr.bf16.mxu0 %v1057_v0  ;;  %934 = vmatprep.subr.bf16.mxu1 %v1057_v0  ;;  %v984_v6 = vld [vmem:[%s1539_s0 + $0x4] ss:$8 sps:$4 sm:$0xff]   ;;  %v987_v8 = vld [vmem:[%s1539_s0 + $0xd4] ss:$8 sps:$4 sm:$0xff]   ;;  %v982_v20 = vld [vmem:[%s1539_s0] ss:$8 sps:$4 sm:$0xff]  }
   0x4   :  { %908 = vmatprep.mubr.msk.bf16.mxu0 %vm424_vm0, %v984_v6  ;;  %921 = vmatprep.mubr.msk.bf16.mxu1 %vm424_vm0, %v987_v8  ;;  %v972_v9 = vld [vmem:[%s1538_s1 + $0x30] sm:$0xff]   ;;  %v973_v10 = vld [vmem:[%s1538_s1 + $0x38] sm:$0xff]   ;;  %v974_v11 = vld [vmem:[%s1538_s1 + $0x40] sm:$0xff]  }
   0x5   :  { %v975_v12 = vld [vmem:[%s1538_s1 + $0x48] sm:$0xff]   ;;  %v976_v13 = vld [vmem:[%s1538_s1 + $0x50] sm:$0xff]   ;;  %v977_v14 = vld [vmem:[%s1538_s1 + $0x58] sm:$0xff]  }
   0x6   :  { %507 = vmatpush1.bf16.msra.mxu0 %v967_v2  ;;  %950 = vmatpush1.bf16.msra.mxu1 %v967_v2  ;;  %v978_v15 = vld [vmem:[%s1538_s1 + $0x60] sm:$0xff]   ;;  %v979_v16 = vld [vmem:[%s1538_s1 + $0x68] sm:$0xff]   ;;  %v980_v17 = vld [vmem:[%s1538_s1 + $0x70] sm:$0xff]  }
   0x7   :  { %508 = vmatprep.subr.bf16.mxu0 %v1057_v0  ;;  %935 = vmatprep.subr.bf16.mxu1 %v1057_v0  ;;  %v981_v18 = vld [vmem:[%s1538_s1 + $0x78] sm:$0x1f]   ;;  %v991_v23 = vld [vmem:[%s1539_s0 + $0xe4] ss:$8 sps:$4 sm:$0xff]   ;;  %v993_v25 = vld [vmem:[%s1539_s0 + $0xe0] ss:$8 sps:$4 sm:$0xff]  }
   0x8   :  { %v502_v19 = vsel %vm500_vm1, %v981_v18, 0  ;;  %v985_v21 = vld [vmem:[%s1539_s0 + $0xd0] ss:$8 sps:$4 sm:$0xff]   ;;  %v988_v22 = vld [vmem:[%s1539_s0 + $0x14] ss:$8 sps:$4 sm:$0xff]  }
   0x9   :  { %v990_v24 = vld [vmem:[%s1539_s0 + $0x10] ss:$8 sps:$4 sm:$0xff]   ;;  %v994_v26 = vld [vmem:[%s1539_s0 + $0x24] ss:$8 sps:$4 sm:$0xff]   ;;  %v997_v27 = vld [vmem:[%s1539_s0 + $0xf4] ss:$8 sps:$4 sm:$0xff]  }
   0xa   :  { %509 = vmatpush1.bf16.msra.mxu0 %v968_v3  ;;  %951 = vmatpush1.bf16.msra.mxu1 %v968_v3  ;;  %v996_v28 = vld [vmem:[%s1539_s0 + $0x20] ss:$8 sps:$4 sm:$0xff]   ;;  %v999_v29 = vld [vmem:[%s1539_s0 + $0xf0] ss:$8 sps:$4 sm:$0xff]   ;;  %v1000_v30 = vld [vmem:[%s1539_s0 + $0x34] ss:$8 sps:$4 sm:$0xff]  }
   0xb   :  { %510 = vmatprep.subr.bf16.mxu0 %v1057_v0  ;;  %936 = vmatprep.subr.bf16.mxu1 %v1057_v0  ;;  %v1003_v31 = vld [vmem:[%s1539_s0 + $0x104] ss:$8 sps:$4 sm:$0xff]   ;;  %v1002_v32 = vld [vmem:[%s1539_s0 + $0x30] ss:$8 sps:$4 sm:$0xff]   ;;  %v1005_v33 = vld [vmem:[%s1539_s0 + $0x100] ss:$8 sps:$4 sm:$0xff]  }
   0xc   :  { %v1006_v34 = vld [vmem:[%s1539_s0 + $0x44] ss:$8 sps:$4 sm:$0xff]   ;;  %v1009_v35 = vld [vmem:[%s1539_s0 + $0x114] ss:$8 sps:$4 sm:$0xff]   ;;  %v1008_v36 = vld [vmem:[%s1539_s0 + $0x40] ss:$8 sps:$4 sm:$0xff]  }
   0xd   :  { %v1011_v37 = vld [vmem:[%s1539_s0 + $0x110] ss:$8 sps:$4 sm:$0xff]   ;;  %v1012_v38 = vld [vmem:[%s1539_s0 + $0x54] ss:$8 sps:$4 sm:$0xff]   ;;  %v1015_v39 = vld [vmem:[%s1539_s0 + $0x124] ss:$8 sps:$4 sm:$0xff]  }
   0xe   :  { %511 = vmatpush1.bf16.msra.mxu0 %v969_v4  ;;  %952 = vmatpush1.bf16.msra.mxu1 %v969_v4  ;;  %v1014_v40 = vld [vmem:[%s1539_s0 + $0x50] ss:$8 sps:$4 sm:$0xff]   ;;  %v1017_v41 = vld [vmem:[%s1539_s0 + $0x120] ss:$8 sps:$4 sm:$0xff]   ;;  %v1018_v42 = vld [vmem:[%s1539_s0 + $0x64] ss:$8 sps:$4 sm:$0xff]  }
   0xf   :  { %512 = vmatprep.subr.bf16.mxu0 %v1057_v0  ;;  %937 = vmatprep.subr.bf16.mxu1 %v1057_v0  ;;  %v1021_v43 = vld [vmem:[%s1539_s0 + $0x134] ss:$8 sps:$4 sm:$0xff]   ;;  %v1020_v44 = vld [vmem:[%s1539_s0 + $0x60] ss:$8 sps:$4 sm:$0xff]   ;;  %v1023_v45 = vld [vmem:[%s1539_s0 + $0x130] ss:$8 sps:$4 sm:$0xff]  }
  0x10   :  { %v1024_v46 = vld [vmem:[%s1539_s0 + $0x74] ss:$8 sps:$4 sm:$0xff]   ;;  %v1027_v47 = vld [vmem:[%s1539_s0 + $0x144] ss:$8 sps:$4 sm:$0xff]   ;;  %v1026_v48 = vld [vmem:[%s1539_s0 + $0x70] ss:$8 sps:$4 sm:$0xff]  }
  0x11   :  { %v1029_v49 = vld [vmem:[%s1539_s0 + $0x140] ss:$8 sps:$4 sm:$0xff]   ;;  %v1030_v50 = vld [vmem:[%s1539_s0 + $0x84] ss:$8 sps:$4 sm:$0xff]   ;;  %v1033_v51 = vld [vmem:[%s1539_s0 + $0x154] ss:$8 sps:$4 sm:$0xff]  }
  0x12   :  { %513 = vmatpush1.bf16.msra.mxu0 %v970_v5  ;;  %953 = vmatpush1.bf16.msra.mxu1 %v970_v5  ;;  %v1032_v52 = vld [vmem:[%s1539_s0 + $0x80] ss:$8 sps:$4 sm:$0xff]   ;;  %v1035_v53 = vld [vmem:[%s1539_s0 + $0x150] ss:$8 sps:$4 sm:$0xff]   ;;  %v1036_v54 = vld [vmem:[%s1539_s0 + $0x94] ss:$8 sps:$4 sm:$0xff]  }
  0x13   :  { %514 = vmatprep.subr.bf16.mxu0 %v1057_v0  ;;  %938 = vmatprep.subr.bf16.mxu1 %v1057_v0  ;;  %v1039_v55 = vld [vmem:[%s1539_s0 + $0x164] ss:$8 sps:$4 sm:$0xff]   ;;  %v1038_v56 = vld [vmem:[%s1539_s0 + $0x90] ss:$8 sps:$4 sm:$0xff]   ;;  %v1041_v57 = vld [vmem:[%s1539_s0 + $0x160] ss:$8 sps:$4 sm:$0xff]  }
  0x14   :  { %v1042_v58 = vld [vmem:[%s1539_s0 + $0xa4] ss:$8 sps:$4 sm:$0xff]   ;;  %v1045_v59 = vld [vmem:[%s1539_s0 + $0x174] ss:$8 sps:$4 sm:$0xff]   ;;  %v1044_v60 = vld [vmem:[%s1539_s0 + $0xa0] ss:$8 sps:$4 sm:$0xff]  }
  0x15   :  { %v1047_v61 = vld [vmem:[%s1539_s0 + $0x170] ss:$8 sps:$4 sm:$0xff]   ;;  %v1048_v62 = vld [vmem:[%s1539_s0 + $0xb4] ss:$8 sps:$4 sm:$0xff]   ;;  %v1051_v63 = vld [vmem:[%s1539_s0 + $0x184] ss:$8 sps:$4 sm:$0xff]  }
  0x16   :  { %515 = vmatpush1.bf16.msra.mxu0 %v971_v7  ;;  %954 = vmatpush1.bf16.msra.mxu1 %v971_v7  ;;  %v1053_v1 = vld [vmem:[%s1539_s0 + $0x180] ss:$8 sps:$4 sm:$0xff]   ;;  %v1054_v2 = vld [vmem:[%s1539_s0 + $0xc4] ss:$8 sps:$4 sm:$0xff]  }
  0x17   :  { %516 = vmatprep.subr.bf16.mxu0 %v1057_v0  ;;  %939 = vmatprep.subr.bf16.mxu1 %v1057_v0  ;;  %v1056_v3 = vld [vmem:[%s1539_s0 + $0xc0] ss:$8 sps:$4 sm:$0xff]  }
  0x18   :  { %v1336_v4 = vld [vmem:[%s1540_s2] ss:$0 sm:$0xff] }
  0x1a   :  { %517 = vmatpush1.bf16.msra.mxu0 %v972_v9  ;;  %955 = vmatpush1.bf16.msra.mxu1 %v972_v9 }
  0x1b   :  { %518 = vmatprep.subr.bf16.mxu0 %v1057_v0  ;;  %940 = vmatprep.subr.bf16.mxu1 %v1057_v0 }
  0x1e   :  { %519 = vmatpush1.bf16.msra.mxu0 %v973_v10  ;;  %956 = vmatpush1.bf16.msra.mxu1 %v973_v10 }
  0x1f   :  { %520 = vmatprep.subr.bf16.mxu0 %v1057_v0  ;;  %941 = vmatprep.subr.bf16.mxu1 %v1057_v0 }
  0x22   :  { %521 = vmatpush1.bf16.msra.mxu0 %v974_v11  ;;  %957 = vmatpush1.bf16.msra.mxu1 %v974_v11 }
  0x23   :  { %522 = vmatprep.subr.bf16.mxu0 %v1057_v0  ;;  %942 = vmatprep.subr.bf16.mxu1 %v1057_v0 }
  0x26   :  { %523 = vmatpush1.bf16.msra.mxu0 %v975_v12  ;;  %958 = vmatpush1.bf16.msra.mxu1 %v975_v12 }
  0x27   :  { %524 = vmatprep.subr.bf16.mxu0 %v1057_v0  ;;  %943 = vmatprep.subr.bf16.mxu1 %v1057_v0 }
  0x2a   :  { %525 = vmatpush1.bf16.msra.mxu0 %v976_v13  ;;  %959 = vmatpush1.bf16.msra.mxu1 %v976_v13 }
  0x2b   :  { %526 = vmatprep.subr.bf16.mxu0 %v1057_v0  ;;  %944 = vmatprep.subr.bf16.mxu1 %v1057_v0 }
  0x2e   :  { %527 = vmatpush1.bf16.msra.mxu0 %v977_v14  ;;  %960 = vmatpush1.bf16.msra.mxu1 %v977_v14 }
  0x2f   :  { %528 = vmatprep.subr.bf16.mxu0 %v1057_v0  ;;  %945 = vmatprep.subr.bf16.mxu1 %v1057_v0 }
  0x32   :  { %529 = vmatpush1.bf16.msra.mxu0 %v978_v15  ;;  %961 = vmatpush1.bf16.msra.mxu1 %v978_v15 }
  0x33   :  { %530 = vmatprep.subr.bf16.mxu0 %v1057_v0  ;;  %946 = vmatprep.subr.bf16.mxu1 %v1057_v0 }
  0x36   :  { %531 = vmatpush1.bf16.msra.mxu0 %v979_v16  ;;  %962 = vmatpush1.bf16.msra.mxu1 %v979_v16 }
  0x37   :  { %532 = vmatprep.subr.bf16.mxu0 %v1057_v0  ;;  %947 = vmatprep.subr.bf16.mxu1 %v1057_v0 }
  0x3a   :  { %533 = vmatpush1.bf16.msra.mxu0 %v980_v17  ;;  %963 = vmatpush1.bf16.msra.mxu1 %v980_v17 }
  0x3b   :  { %534 = vmatprep.subr.bf16.mxu0 %v1057_v0  ;;  %948 = vmatprep.subr.bf16.mxu1 %v1057_v0  ;;  %v1050_v0 = vld [vmem:[%s1539_s0 + $0xb0] ss:$8 sps:$4 sm:$0xff]  }
  0x3e   :  { %535 = vmatpush1.bf16.msra.mxu0 %v502_v19  ;;  %964 = vmatpush1.bf16.msra.mxu1 %v502_v19 }
  0x41   :  { %537 = vmatmul.mubr.bf16.vlgmr.msra.gmra.mrb[0].mxu0 %v982_v20  ;;  %641 = vmatmul.mubr.bf16.vlgmr.msra.gmra.mrb[0].mxu1 %v985_v21 }
  0x42   :  { %909 = vmatprep.mubr.msk.bf16.mxu0 %vm424_vm0, %v988_v22  ;;  %922 = vmatprep.mubr.msk.bf16.mxu1 %vm424_vm0, %v991_v23 }
  0x49   :  { %545 = vmatmul.mubr.bf16.gmra.mrb[4].mxu0 %v990_v24  ;;  %649 = vmatmul.mubr.bf16.gmra.mrb[4].mxu1 %v993_v25 }
  0x4a   :  { %910 = vmatprep.mubr.msk.bf16.mxu0 %vm424_vm0, %v994_v26  ;;  %923 = vmatprep.mubr.msk.bf16.mxu1 %vm424_vm0, %v997_v27 }
  0x51   :  { %553 = vmatmul.mubr.bf16.gmra.mrb[8].mxu0 %v996_v28  ;;  %657 = vmatmul.mubr.bf16.gmra.mrb[8].mxu1 %v999_v29 }
  0x52   :  { %911 = vmatprep.mubr.msk.bf16.mxu0 %vm424_vm0, %v1000_v30  ;;  %924 = vmatprep.mubr.msk.bf16.mxu1 %vm424_vm0, %v1003_v31 }
  0x59   :  { %561 = vmatmul.mubr.bf16.gmra.mrb[12].mxu0 %v1002_v32  ;;  %665 = vmatmul.mubr.bf16.gmra.mrb[12].mxu1 %v1005_v33 }
  0x5a   :  { %912 = vmatprep.mubr.msk.bf16.mxu0 %vm424_vm0, %v1006_v34  ;;  %925 = vmatprep.mubr.msk.bf16.mxu1 %vm424_vm0, %v1009_v35 }
  0x61   :  { %569 = vmatmul.mubr.bf16.gmra.mrb[16].mxu0 %v1008_v36  ;;  %673 = vmatmul.mubr.bf16.gmra.mrb[16].mxu1 %v1011_v37 }
  0x62   :  { %913 = vmatprep.mubr.msk.bf16.mxu0 %vm424_vm0, %v1012_v38  ;;  %926 = vmatprep.mubr.msk.bf16.mxu1 %vm424_vm0, %v1015_v39 }
  0x69   :  { %577 = vmatmul.mubr.bf16.gmra.mrb[20].mxu0 %v1014_v40  ;;  %681 = vmatmul.mubr.bf16.gmra.mrb[20].mxu1 %v1017_v41 }
  0x6a   :  { %914 = vmatprep.mubr.msk.bf16.mxu0 %vm424_vm0, %v1018_v42  ;;  %927 = vmatprep.mubr.msk.bf16.mxu1 %vm424_vm0, %v1021_v43 }
  0x71   :  { %585 = vmatmul.mubr.bf16.gmra.mrb[24].mxu0 %v1020_v44  ;;  %689 = vmatmul.mubr.bf16.gmra.mrb[24].mxu1 %v1023_v45 }
  0x72   :  { %915 = vmatprep.mubr.msk.bf16.mxu0 %vm424_vm0, %v1024_v46  ;;  %928 = vmatprep.mubr.msk.bf16.mxu1 %vm424_vm0, %v1027_v47 }
  0x79   :  { %593 = vmatmul.mubr.bf16.gmra.mrb[28].mxu0 %v1026_v48  ;;  %697 = vmatmul.mubr.bf16.gmra.mrb[28].mxu1 %v1029_v49 }
  0x7a   :  { %916 = vmatprep.mubr.msk.bf16.mxu0 %vm424_vm0, %v1030_v50  ;;  %929 = vmatprep.mubr.msk.bf16.mxu1 %vm424_vm0, %v1033_v51 }
  0x81   :  { %601 = vmatmul.mubr.bf16.gmra.mrb[32].mxu0 %v1032_v52  ;;  %705 = vmatmul.mubr.bf16.gmra.mrb[32].mxu1 %v1035_v53 }
  0x82   :  { %917 = vmatprep.mubr.msk.bf16.mxu0 %vm424_vm0, %v1036_v54  ;;  %930 = vmatprep.mubr.msk.bf16.mxu1 %vm424_vm0, %v1039_v55 }
  0x89   :  { %609 = vmatmul.mubr.bf16.gmra.mrb[36].mxu0 %v1038_v56  ;;  %713 = vmatmul.mubr.bf16.gmra.mrb[36].mxu1 %v1041_v57 }
  0x8a   :  { %918 = vmatprep.mubr.msk.bf16.mxu0 %vm424_vm0, %v1042_v58  ;;  %931 = vmatprep.mubr.msk.bf16.mxu1 %vm424_vm0, %v1045_v59 }
  0x91   :  { %617 = vmatmul.mubr.bf16.gmra.mrb[40].mxu0 %v1044_v60  ;;  %721 = vmatmul.mubr.bf16.gmra.mrb[40].mxu1 %v1047_v61 }
  0x92   :  { %919 = vmatprep.mubr.msk.bf16.mxu0 %vm424_vm0, %v1048_v62  ;;  %932 = vmatprep.mubr.msk.bf16.mxu1 %vm424_vm0, %v1051_v63 }
  0x99   :  { %625 = vmatmul.mubr.bf16.gmra.mrb[44].mxu0 %v1050_v0  ;;  %729 = vmatmul.mubr.bf16.gmra.mrb[44].mxu1 %v1053_v1 }
  0x9a   :  { %920 = vmatprep.mubr.msk.bf16.mxu0 %vm424_vm0, %v1054_v2 }
  0xa1   :  { %633 = vmatmul.mubr.bf16.gmra.mrb[48].mxu0 %v1056_v3 }
 0x114   :  { %v538_v5 = vpop.f32.mrb[0].mxu0  ;;  %v642_v6 = vpop.f32.mrb[0].mxu1 }
 0x115   :  { %v539_v7 = vadd.f32 %v1336_v4, %v538_v5  ;;  %v540_v8 = vpop.f32.mrb[1].mxu0  ;;  %v643_v9 = vadd.f32 %v1336_v4, %v642_v6  ;;  %v644_v10 = vpop.f32.mrb[1].mxu1 }
 0x116   :  { %v541_v11 = vpop.f32.mrb[2].mxu0  ;;  %v645_v12 = vpop.f32.mrb[2].mxu1 }
 0x117   :  { %v737_v13 = vmax.f32 %v539_v7, 0.0  ;;  %v542_v14 = vadd.f32 %v1336_v4, %v541_v11  ;;  %v543_v15 = vpop.f32.mrb[3].mxu0  ;;  %v763_v16 = vmax.f32 %v643_v9, 0.0  ;;  %v646_v17 = vadd.f32 %v1336_v4, %v645_v12  ;;  %v647_v18 = vpop.f32.mrb[3].mxu1 }
 0x119   :  { %787 = vst [vmem:[%s1541_s3] sm:$0xff] %v737_v13  ;;  %v738_v19 = vmax.f32 %v542_v14, 0.0  ;;  %813 = vst [vmem:[%s1541_s3 + $0xd0] sm:$0xff] %v763_v16  ;;  %v764_v20 = vmax.f32 %v646_v17, 0.0 }
 0x11b   :  { %788 = vst [vmem:[%s1541_s3 + $0x8] sm:$0xff] %v738_v19  ;;  %814 = vst [vmem:[%s1541_s3 + $0xd8] sm:$0xff] %v764_v20 }
 0x11c   :  { %v546_v21 = vpop.f32.mrb[4].mxu0  ;;  %v650_v22 = vpop.f32.mrb[4].mxu1 }
 0x11d   :  { %v547_v23 = vadd.f32 %v1336_v4, %v546_v21  ;;  %v548_v24 = vpop.f32.mrb[5].mxu0  ;;  %v651_v25 = vadd.f32 %v1336_v4, %v650_v22  ;;  %v652_v26 = vpop.f32.mrb[5].mxu1 }
 0x11e   :  { %v549_v27 = vpop.f32.mrb[6].mxu0  ;;  %v653_v28 = vpop.f32.mrb[6].mxu1 }
 0x11f   :  { %v739_v29 = vmax.f32 %v547_v23, 0.0  ;;  %v550_v30 = vadd.f32 %v1336_v4, %v549_v27  ;;  %v551_v31 = vpop.f32.mrb[7].mxu0  ;;  %v765_v32 = vmax.f32 %v651_v25, 0.0  ;;  %v654_v33 = vadd.f32 %v1336_v4, %v653_v28  ;;  %v655_v34 = vpop.f32.mrb[7].mxu1 }
 0x121   :  { %789 = vst [vmem:[%s1541_s3 + $0x10] sm:$0xff] %v739_v29  ;;  %v740_v35 = vmax.f32 %v550_v30, 0.0  ;;  %815 = vst [vmem:[%s1541_s3 + $0xe0] sm:$0xff] %v765_v32  ;;  %v766_v36 = vmax.f32 %v654_v33, 0.0 }
 0x123   :  { %790 = vst [vmem:[%s1541_s3 + $0x18] sm:$0xff] %v740_v35  ;;  %816 = vst [vmem:[%s1541_s3 + $0xe8] sm:$0xff] %v766_v36 }
 0x124   :  { %v554_v37 = vpop.f32.mrb[8].mxu0  ;;  %v658_v38 = vpop.f32.mrb[8].mxu1 }
 0x125   :  { %v555_v39 = vadd.f32 %v1336_v4, %v554_v37  ;;  %v556_v40 = vpop.f32.mrb[9].mxu0  ;;  %v659_v41 = vadd.f32 %v1336_v4, %v658_v38  ;;  %v660_v42 = vpop.f32.mrb[9].mxu1 }
 0x126   :  { %v557_v43 = vpop.f32.mrb[10].mxu0  ;;  %v661_v44 = vpop.f32.mrb[10].mxu1 }
 0x127   :  { %v741_v45 = vmax.f32 %v555_v39, 0.0  ;;  %v558_v46 = vadd.f32 %v1336_v4, %v557_v43  ;;  %v559_v47 = vpop.f32.mrb[11].mxu0  ;;  %v767_v48 = vmax.f32 %v659_v41, 0.0  ;;  %v662_v49 = vadd.f32 %v1336_v4, %v661_v44  ;;  %v663_v50 = vpop.f32.mrb[11].mxu1 }
 0x129   :  { %791 = vst [vmem:[%s1541_s3 + $0x20] sm:$0xff] %v741_v45  ;;  %v742_v51 = vmax.f32 %v558_v46, 0.0  ;;  %817 = vst [vmem:[%s1541_s3 + $0xf0] sm:$0xff] %v767_v48  ;;  %v768_v52 = vmax.f32 %v662_v49, 0.0 }
 0x12b   :  { %792 = vst [vmem:[%s1541_s3 + $0x28] sm:$0xff] %v742_v51  ;;  %818 = vst [vmem:[%s1541_s3 + $0xf8] sm:$0xff] %v768_v52 }
 0x12c   :  { %v562_v53 = vpop.f32.mrb[12].mxu0  ;;  %v666_v54 = vpop.f32.mrb[12].mxu1 }
 0x12d   :  { %v563_v55 = vadd.f32 %v1336_v4, %v562_v53  ;;  %v564_v56 = vpop.f32.mrb[13].mxu0  ;;  %v667_v57 = vadd.f32 %v1336_v4, %v666_v54  ;;  %v668_v58 = vpop.f32.mrb[13].mxu1 }
 0x12e   :  { %v565_v59 = vpop.f32.mrb[14].mxu0  ;;  %v669_v60 = vpop.f32.mrb[14].mxu1 }
 0x12f   :  { %v743_v61 = vmax.f32 %v563_v55, 0.0  ;;  %v566_v62 = vadd.f32 %v1336_v4, %v565_v59  ;;  %v567_v63 = vpop.f32.mrb[15].mxu0  ;;  %v769_v0 = vmax.f32 %v667_v57, 0.0  ;;  %v670_v1 = vadd.f32 %v1336_v4, %v669_v60  ;;  %v671_v2 = vpop.f32.mrb[15].mxu1 }
 0x131   :  { %793 = vst [vmem:[%s1541_s3 + $0x30] sm:$0xff] %v743_v61  ;;  %v744_v3 = vmax.f32 %v566_v62, 0.0  ;;  %819 = vst [vmem:[%s1541_s3 + $0x100] sm:$0xff] %v769_v0  ;;  %v770_v5 = vmax.f32 %v670_v1, 0.0 }
 0x133   :  { %794 = vst [vmem:[%s1541_s3 + $0x38] sm:$0xff] %v744_v3  ;;  %820 = vst [vmem:[%s1541_s3 + $0x108] sm:$0xff] %v770_v5 }
 0x134   :  { %v570_v6 = vpop.f32.mrb[16].mxu0  ;;  %v674_v7 = vpop.f32.mrb[16].mxu1 }
 0x135   :  { %v571_v8 = vadd.f32 %v1336_v4, %v570_v6  ;;  %v572_v9 = vpop.f32.mrb[17].mxu0  ;;  %v675_v10 = vadd.f32 %v1336_v4, %v674_v7  ;;  %v676_v11 = vpop.f32.mrb[17].mxu1 }
 0x136   :  { %v573_v12 = vpop.f32.mrb[18].mxu0  ;;  %v677_v13 = vpop.f32.mrb[18].mxu1 }
 0x137   :  { %v745_v14 = vmax.f32 %v571_v8, 0.0  ;;  %v574_v15 = vadd.f32 %v1336_v4, %v573_v12  ;;  %v575_v16 = vpop.f32.mrb[19].mxu0  ;;  %v771_v17 = vmax.f32 %v675_v10, 0.0  ;;  %v678_v18 = vadd.f32 %v1336_v4, %v677_v13  ;;  %v679_v19 = vpop.f32.mrb[19].mxu1 }
 0x139   :  { %795 = vst [vmem:[%s1541_s3 + $0x40] sm:$0xff] %v745_v14  ;;  %v746_v20 = vmax.f32 %v574_v15, 0.0  ;;  %821 = vst [vmem:[%s1541_s3 + $0x110] sm:$0xff] %v771_v17  ;;  %v772_v21 = vmax.f32 %v678_v18, 0.0 }
 0x13b   :  { %796 = vst [vmem:[%s1541_s3 + $0x48] sm:$0xff] %v746_v20  ;;  %822 = vst [vmem:[%s1541_s3 + $0x118] sm:$0xff] %v772_v21 }
 0x13c   :  { %v578_v22 = vpop.f32.mrb[20].mxu0  ;;  %v682_v23 = vpop.f32.mrb[20].mxu1 }
 0x13d   :  { %v579_v24 = vadd.f32 %v1336_v4, %v578_v22  ;;  %v580_v25 = vpop.f32.mrb[21].mxu0  ;;  %v683_v26 = vadd.f32 %v1336_v4, %v682_v23  ;;  %v684_v27 = vpop.f32.mrb[21].mxu1 }
 0x13e   :  { %v581_v28 = vpop.f32.mrb[22].mxu0  ;;  %v685_v29 = vpop.f32.mrb[22].mxu1 }
 0x13f   :  { %v747_v30 = vmax.f32 %v579_v24, 0.0  ;;  %v582_v31 = vadd.f32 %v1336_v4, %v581_v28  ;;  %v583_v32 = vpop.f32.mrb[23].mxu0  ;;  %v773_v33 = vmax.f32 %v683_v26, 0.0  ;;  %v686_v34 = vadd.f32 %v1336_v4, %v685_v29  ;;  %v687_v35 = vpop.f32.mrb[23].mxu1 }
 0x141   :  { %797 = vst [vmem:[%s1541_s3 + $0x50] sm:$0xff] %v747_v30  ;;  %v748_v36 = vmax.f32 %v582_v31, 0.0  ;;  %823 = vst [vmem:[%s1541_s3 + $0x120] sm:$0xff] %v773_v33  ;;  %v774_v37 = vmax.f32 %v686_v34, 0.0 }
 0x143   :  { %798 = vst [vmem:[%s1541_s3 + $0x58] sm:$0xff] %v748_v36  ;;  %824 = vst [vmem:[%s1541_s3 + $0x128] sm:$0xff] %v774_v37 }
 0x144   :  { %v586_v38 = vpop.f32.mrb[24].mxu0  ;;  %v690_v39 = vpop.f32.mrb[24].mxu1 }
 0x145   :  { %v587_v40 = vadd.f32 %v1336_v4, %v586_v38  ;;  %v588_v41 = vpop.f32.mrb[25].mxu0  ;;  %v691_v42 = vadd.f32 %v1336_v4, %v690_v39  ;;  %v692_v43 = vpop.f32.mrb[25].mxu1 }
 0x146   :  { %v589_v44 = vpop.f32.mrb[26].mxu0  ;;  %v693_v45 = vpop.f32.mrb[26].mxu1 }
 0x147   :  { %v749_v46 = vmax.f32 %v587_v40, 0.0  ;;  %v590_v47 = vadd.f32 %v1336_v4, %v589_v44  ;;  %v591_v48 = vpop.f32.mrb[27].mxu0  ;;  %v775_v49 = vmax.f32 %v691_v42, 0.0  ;;  %v694_v50 = vadd.f32 %v1336_v4, %v693_v45  ;;  %v695_v51 = vpop.f32.mrb[27].mxu1 }
 0x149   :  { %799 = vst [vmem:[%s1541_s3 + $0x60] sm:$0xff] %v749_v46  ;;  %v750_v52 = vmax.f32 %v590_v47, 0.0  ;;  %825 = vst [vmem:[%s1541_s3 + $0x130] sm:$0xff] %v775_v49  ;;  %v776_v53 = vmax.f32 %v694_v50, 0.0 }
 0x14b   :  { %800 = vst [vmem:[%s1541_s3 + $0x68] sm:$0xff] %v750_v52  ;;  %826 = vst [vmem:[%s1541_s3 + $0x138] sm:$0xff] %v776_v53 }
 0x14c   :  { %v594_v54 = vpop.f32.mrb[28].mxu0  ;;  %v698_v55 = vpop.f32.mrb[28].mxu1 }
 0x14d   :  { %v595_v56 = vadd.f32 %v1336_v4, %v594_v54  ;;  %v596_v57 = vpop.f32.mrb[29].mxu0  ;;  %v699_v58 = vadd.f32 %v1336_v4, %v698_v55  ;;  %v700_v59 = vpop.f32.mrb[29].mxu1 }
 0x14e   :  { %v597_v60 = vpop.f32.mrb[30].mxu0  ;;  %v701_v61 = vpop.f32.mrb[30].mxu1 }
 0x14f   :  { %v751_v62 = vmax.f32 %v595_v56, 0.0  ;;  %v598_v63 = vadd.f32 %v1336_v4, %v597_v60  ;;  %v599_v0 = vpop.f32.mrb[31].mxu0  ;;  %v777_v1 = vmax.f32 %v699_v58, 0.0  ;;  %v702_v2 = vadd.f32 %v1336_v4, %v701_v61  ;;  %v703_v3 = vpop.f32.mrb[31].mxu1 }
 0x151   :  { %801 = vst [vmem:[%s1541_s3 + $0x70] sm:$0xff] %v751_v62  ;;  %v752_v5 = vmax.f32 %v598_v63, 0.0  ;;  %827 = vst [vmem:[%s1541_s3 + $0x140] sm:$0xff] %v777_v1  ;;  %v778_v6 = vmax.f32 %v702_v2, 0.0 }
 0x153   :  { %802 = vst [vmem:[%s1541_s3 + $0x78] sm:$0xff] %v752_v5  ;;  %828 = vst [vmem:[%s1541_s3 + $0x148] sm:$0xff] %v778_v6 }
 0x154   :  { %v602_v7 = vpop.f32.mrb[32].mxu0  ;;  %v706_v8 = vpop.f32.mrb[32].mxu1 }
 0x155   :  { %v603_v9 = vadd.f32 %v1336_v4, %v602_v7  ;;  %v604_v10 = vpop.f32.mrb[33].mxu0  ;;  %v707_v11 = vadd.f32 %v1336_v4, %v706_v8  ;;  %v708_v12 = vpop.f32.mrb[33].mxu1 }
 0x156   :  { %v605_v13 = vpop.f32.mrb[34].mxu0  ;;  %v709_v14 = vpop.f32.mrb[34].mxu1 }
 0x157   :  { %v753_v15 = vmax.f32 %v603_v9, 0.0  ;;  %v606_v16 = vadd.f32 %v1336_v4, %v605_v13  ;;  %v607_v17 = vpop.f32.mrb[35].mxu0  ;;  %v779_v18 = vmax.f32 %v707_v11, 0.0  ;;  %v710_v19 = vadd.f32 %v1336_v4, %v709_v14  ;;  %v711_v20 = vpop.f32.mrb[35].mxu1 }
 0x159   :  { %803 = vst [vmem:[%s1541_s3 + $0x80] sm:$0xff] %v753_v15  ;;  %v754_v21 = vmax.f32 %v606_v16, 0.0  ;;  %829 = vst [vmem:[%s1541_s3 + $0x150] sm:$0xff] %v779_v18  ;;  %v780_v22 = vmax.f32 %v710_v19, 0.0 }
 0x15b   :  { %804 = vst [vmem:[%s1541_s3 + $0x88] sm:$0xff] %v754_v21  ;;  %830 = vst [vmem:[%s1541_s3 + $0x158] sm:$0xff] %v780_v22 }
 0x15c   :  { %v610_v23 = vpop.f32.mrb[36].mxu0  ;;  %v714_v24 = vpop.f32.mrb[36].mxu1 }
 0x15d   :  { %v611_v25 = vadd.f32 %v1336_v4, %v610_v23  ;;  %v612_v26 = vpop.f32.mrb[37].mxu0  ;;  %v715_v27 = vadd.f32 %v1336_v4, %v714_v24  ;;  %v716_v28 = vpop.f32.mrb[37].mxu1 }
 0x15e   :  { %v613_v29 = vpop.f32.mrb[38].mxu0  ;;  %v717_v30 = vpop.f32.mrb[38].mxu1 }
 0x15f   :  { %v755_v31 = vmax.f32 %v611_v25, 0.0  ;;  %v614_v32 = vadd.f32 %v1336_v4, %v613_v29  ;;  %v615_v33 = vpop.f32.mrb[39].mxu0  ;;  %v781_v34 = vmax.f32 %v715_v27, 0.0  ;;  %v718_v35 = vadd.f32 %v1336_v4, %v717_v30  ;;  %v719_v36 = vpop.f32.mrb[39].mxu1 }
 0x161   :  { %805 = vst [vmem:[%s1541_s3 + $0x90] sm:$0xff] %v755_v31  ;;  %v756_v37 = vmax.f32 %v614_v32, 0.0  ;;  %831 = vst [vmem:[%s1541_s3 + $0x160] sm:$0xff] %v781_v34  ;;  %v782_v38 = vmax.f32 %v718_v35, 0.0 }
 0x163   :  { %806 = vst [vmem:[%s1541_s3 + $0x98] sm:$0xff] %v756_v37  ;;  %832 = vst [vmem:[%s1541_s3 + $0x168] sm:$0xff] %v782_v38 }
 0x164   :  { %v618_v39 = vpop.f32.mrb[40].mxu0  ;;  %v722_v40 = vpop.f32.mrb[40].mxu1 }
 0x165   :  { %v619_v41 = vadd.f32 %v1336_v4, %v618_v39  ;;  %v620_v42 = vpop.f32.mrb[41].mxu0  ;;  %v723_v43 = vadd.f32 %v1336_v4, %v722_v40  ;;  %v724_v44 = vpop.f32.mrb[41].mxu1 }
 0x166   :  { %v621_v45 = vpop.f32.mrb[42].mxu0  ;;  %v725_v46 = vpop.f32.mrb[42].mxu1 }
 0x167   :  { %v757_v47 = vmax.f32 %v619_v41, 0.0  ;;  %v622_v48 = vadd.f32 %v1336_v4, %v621_v45  ;;  %v623_v49 = vpop.f32.mrb[43].mxu0  ;;  %v783_v50 = vmax.f32 %v723_v43, 0.0  ;;  %v726_v51 = vadd.f32 %v1336_v4, %v725_v46  ;;  %v727_v52 = vpop.f32.mrb[43].mxu1 }
 0x169   :  { %807 = vst [vmem:[%s1541_s3 + $0xa0] sm:$0xff] %v757_v47  ;;  %v758_v53 = vmax.f32 %v622_v48, 0.0  ;;  %833 = vst [vmem:[%s1541_s3 + $0x170] sm:$0xff] %v783_v50  ;;  %v784_v54 = vmax.f32 %v726_v51, 0.0 }
 0x16b   :  { %808 = vst [vmem:[%s1541_s3 + $0xa8] sm:$0xff] %v758_v53  ;;  %834 = vst [vmem:[%s1541_s3 + $0x178] sm:$0xff] %v784_v54 }
 0x16c   :  { %v626_v55 = vpop.f32.mrb[44].mxu0  ;;  %v730_v56 = vpop.f32.mrb[44].mxu1 }
 0x16d   :  { %v627_v57 = vadd.f32 %v1336_v4, %v626_v55  ;;  %v628_v58 = vpop.f32.mrb[45].mxu0  ;;  %v731_v59 = vadd.f32 %v1336_v4, %v730_v56  ;;  %v732_v60 = vpop.f32.mrb[45].mxu1 }
 0x16e   :  { %v629_v61 = vpop.f32.mrb[46].mxu0  ;;  %v733_v62 = vpop.f32.mrb[46].mxu1 }
 0x16f   :  { %v759_v63 = vmax.f32 %v627_v57, 0.0  ;;  %v630_v0 = vadd.f32 %v1336_v4, %v629_v61  ;;  %v631_v1 = vpop.f32.mrb[47].mxu0  ;;  %v785_v2 = vmax.f32 %v731_v59, 0.0  ;;  %v734_v3 = vadd.f32 %v1336_v4, %v733_v62  ;;  %v735_v5 = vpop.f32.mrb[47].mxu1 }
 0x171   :  { %809 = vst [vmem:[%s1541_s3 + $0xb0] sm:$0xff] %v759_v63  ;;  %v760_v6 = vmax.f32 %v630_v0, 0.0  ;;  %835 = vst [vmem:[%s1541_s3 + $0x180] sm:$0xff] %v785_v2  ;;  %v786_v7 = vmax.f32 %v734_v3, 0.0 }
 0x173   :  { %810 = vst [vmem:[%s1541_s3 + $0xb8] sm:$0xff] %v760_v6  ;;  %836 = vst [vmem:[%s1541_s3 + $0x188] sm:$0xff] %v786_v7 }
 0x174   :  { %v634_v8 = vpop.f32.mrb[48].mxu0 }
 0x175   :  { %v635_v9 = vadd.f32 %v1336_v4, %v634_v8  ;;  %v636_v10 = vpop.f32.mrb[49].mxu0 }
 0x176   :  { %v637_v11 = vpop.f32.mrb[50].mxu0 }
 0x177   :  { %v761_v12 = vmax.f32 %v635_v9, 0.0  ;;  %v638_v13 = vadd.f32 %v1336_v4, %v637_v11  ;;  %v639_v14 = vpop.f32.mrb[51].mxu0 }
 0x179   :  { %811 = vst [vmem:[%s1541_s3 + $0xc0] sm:$0xff] %v761_v12  ;;  %v762_v15 = vmax.f32 %v638_v13, 0.0 }
 0x17b   :  { %812 = vst [vmem:[%s1541_s3 + $0xc8] sm:$0xff] %v762_v15 }

// kernel: regression_train_forward.5
= control target key start
LH: loop header
LB: loop body
LE: loop exit
PB: predicated region body
PF: predicated region fallthrough
CT: control target
= control target key end

     0   :  { %vm306_vm0 = vcmask 1041408   ;;  %vm302_vm1 = vcmask 949248   ;;  %v783_v38 = vmov 0.0   ;;  %s988_s0 = inlined_call_operand.vmem [shape: bf16[8,500], index: 0, kind: input, shape index: {}]   ;;  %s989_s1 = inlined_call_operand.vmem [shape: bf16[500,128], index: 1, kind: input, shape index: {}]   ;;  %s990_s2 = inlined_call_operand.vmem [shape: f32[1,128], index: 2, kind: input, shape index: {}]   ;;  %s991_s3 = inlined_call_operand.vmem [shape: bf16[128,128], index: 3, kind: input, shape index: {}]   ;;  %s992_s4 = inlined_call_operand.vmem [shape: f32[1,128], index: 4, kind: input, shape index: {}]   ;;  %s993_s5 = inlined_call_operand.vmem [shape: f32[8,128], index: 5, kind: input, shape index: {}]   ;;  %s994_s6 = inlined_call_operand.vmem [shape: f32[8,1], index: 6, kind: input, shape index: {}]   ;;  %s995_s7 = inlined_call_operand.hbm [shape: f32[1,2], index: 7, kind: output, shape index: {}]  }
   0x1   :  { %v707_v0 = vld [vmem:[%s989_s1 + $0x40] sm:$0xff]   ;;  %v711_v4 = vld [vmem:[%s989_s1 + $0x48] sm:$0xff]   ;;  %v715_v8 = vld [vmem:[%s989_s1 + $0x50] sm:$0xff]  }
   0x2   :  { %v708_v1 = vld [vmem:[%s989_s1 + $0xc0] sm:$0xff]   ;;  %629 = vmatprep.subr.bf16.mxu0 %v707_v0  ;;  %v712_v5 = vld [vmem:[%s989_s1 + $0xc8] sm:$0xff]   ;;  %v716_v9 = vld [vmem:[%s989_s1 + $0xd0] sm:$0xff]  }
   0x3   :  { %v709_v2 = vld [vmem:[%s989_s1] sm:$0xff]   ;;  %651 = vmatprep.subr.bf16.mxu1 %v708_v1  ;;  %v713_v6 = vld [vmem:[%s989_s1 + $0x8] sm:$0xff]   ;;  %v717_v10 = vld [vmem:[%s989_s1 + $0x10] sm:$0xff]  }
   0x4   :  { %v710_v3 = vld [vmem:[%s989_s1 + $0x80] sm:$0xff]   ;;  %630 = vmatpush3.bf16.msra.mxu0 %v709_v2  ;;  %v714_v7 = vld [vmem:[%s989_s1 + $0x88] sm:$0xff]   ;;  %v718_v11 = vld [vmem:[%s989_s1 + $0x90] sm:$0xff]  }
   0x5   :  { %652 = vmatpush3.bf16.msra.mxu1 %v710_v3  ;;  %631 = vmatprep.subr.bf16.mxu0 %v711_v4  ;;  %v719_v12 = vld [vmem:[%s989_s1 + $0x58] sm:$0xff]   ;;  %v723_v16 = vld [vmem:[%s989_s1 + $0x60] sm:$0xff]   ;;  %v727_v20 = vld [vmem:[%s989_s1 + $0x68] sm:$0xff]  }
   0x6   :  { %653 = vmatprep.subr.bf16.mxu1 %v712_v5  ;;  %v720_v13 = vld [vmem:[%s989_s1 + $0xd8] sm:$0xff]   ;;  %v724_v17 = vld [vmem:[%s989_s1 + $0xe0] sm:$0xff]   ;;  %v728_v21 = vld [vmem:[%s989_s1 + $0xe8] sm:$0xff]  }
   0x7   :  { %v721_v14 = vld [vmem:[%s989_s1 + $0x18] sm:$0xff]   ;;  %v725_v18 = vld [vmem:[%s989_s1 + $0x20] sm:$0xff]   ;;  %v729_v22 = vld [vmem:[%s989_s1 + $0x28] sm:$0xff]  }
   0x8   :  { %632 = vmatpush3.bf16.msra.mxu0 %v713_v6  ;;  %v722_v15 = vld [vmem:[%s989_s1 + $0x98] sm:$0xff]   ;;  %v726_v19 = vld [vmem:[%s989_s1 + $0xa0] sm:$0xff]   ;;  %v730_v23 = vld [vmem:[%s989_s1 + $0xa8] sm:$0xff]  }
   0x9   :  { %654 = vmatpush3.bf16.msra.mxu1 %v714_v7  ;;  %633 = vmatprep.subr.bf16.mxu0 %v715_v8  ;;  %v731_v24 = vld [vmem:[%s989_s1 + $0x70] sm:$0xff]   ;;  %v735_v28 = vld [vmem:[%s989_s1 + $0x78] sm:$0xff]   ;;  %v28_v32 = vld [vmem:[%s988_s0] sm:$0xff] }
   0xa   :  { %655 = vmatprep.subr.bf16.mxu1 %v716_v9  ;;  %v732_v25 = vld [vmem:[%s989_s1 + $0xf0] sm:$0xff]   ;;  %v736_v29 = vld [vmem:[%s989_s1 + $0xf8] ss:$0 sps:$4 sm:$0x33]   ;;  %v583_v33 = vcombine.low %v28_v32, %v28_v32  ;;  %v584_v34 = vcombine.high %v28_v32, %v28_v32  ;;  %v29_v35 = vld [vmem:[%s988_s0 + $0x8] sm:$0xff] }
   0xb   :  { %v733_v26 = vld [vmem:[%s989_s1 + $0x30] sm:$0xff]   ;;  %v737_v30 = vld [vmem:[%s989_s1 + $0x38] sm:$0xff]   ;;  %v585_v36 = vcombine.low %v29_v35, %v29_v35  ;;  %v586_v37 = vcombine.high %v29_v35, %v29_v35  ;;  %v743_v39 = vld [vmem:[%s991_s3] sm:$0xff]  }
   0xc   :  { %634 = vmatpush3.bf16.msra.mxu0 %v717_v10  ;;  %v734_v27 = vld [vmem:[%s989_s1 + $0xb0] sm:$0xff]   ;;  %v738_v31 = vld [vmem:[%s989_s1 + $0xb8] sm:$0xff]   ;;  %342 = vmatprep.mubr.bf16.mxu0 %v584_v34  ;;  %v744_v40 = vld [vmem:[%s991_s3 + $0x8] sm:$0xff]  }
   0xd   :  { %656 = vmatpush3.bf16.msra.mxu1 %v718_v11  ;;  %635 = vmatprep.subr.bf16.mxu0 %v719_v12 }
   0xe   :  { %657 = vmatprep.subr.bf16.mxu1 %v720_v13  ;;  %619 = vmatprep.mubr.msk.bf16.mxu1 %vm302_vm1, %v586_v37 }
  0x10   :  { %636 = vmatpush3.bf16.msra.mxu0 %v721_v14 }
  0x11   :  { %658 = vmatpush3.bf16.msra.mxu1 %v722_v15  ;;  %637 = vmatprep.subr.bf16.mxu0 %v723_v16 }
  0x12   :  { %659 = vmatprep.subr.bf16.mxu1 %v724_v17 }
  0x14   :  { %638 = vmatpush3.bf16.msra.mxu0 %v725_v18 }
  0x15   :  { %660 = vmatpush3.bf16.msra.mxu1 %v726_v19  ;;  %639 = vmatprep.subr.bf16.mxu0 %v727_v20 }
  0x16   :  { %661 = vmatprep.subr.bf16.mxu1 %v728_v21 }
  0x18   :  { %640 = vmatpush3.bf16.msra.mxu0 %v729_v22 }
  0x19   :  { %662 = vmatpush3.bf16.msra.mxu1 %v730_v23  ;;  %641 = vmatprep.subr.bf16.mxu0 %v731_v24 }
  0x1a   :  { %663 = vmatprep.subr.bf16.mxu1 %v732_v25 }
  0x1c   :  { %642 = vmatpush3.bf16.msra.mxu0 %v733_v26 }
  0x1d   :  { %664 = vmatpush3.bf16.msra.mxu1 %v734_v27  ;;  %643 = vmatprep.subr.bf16.mxu0 %v735_v28 }
  0x1e   :  { %702 = vmatprep.subr.msk.bf16.mxu1 %vm306_vm0, %v736_v29 }
  0x20   :  { %644 = vmatpush3.bf16.msra.mxu0 %v737_v30 }
  0x21   :  { %666 = vmatpush3.bf16.msra.mxu1 %v738_v31  ;;  %682 = vmatprep.subr.bf16.mxu0 %v783_v38 }
  0x23   :  { %343 = vmatmul.mubr.bf16.vlgmr.msra.gmra.mrb[0].mxu0 %v583_v33 }
  0x24   :  { %383 = vmatmul.mubr.bf16.vlgmr.msra.gmra.mrb[0].mxu1 %v585_v36  ;;  %683 = vmatpush3.bf16.msra.mxu0 %v743_v39 }
  0x25   :  { %684 = vmatprep.subr.bf16.mxu0 %v783_v38 }
  0x26   :  { %12 = vsyncpa [#allocation3], 0  ;;  %v745_v41 = vld [vmem:[%s991_s3 + $0x10] sm:$0xff]   ;;  %v746_v42 = vld [vmem:[%s991_s3 + $0x18] sm:$0xff]   ;;  %vm784_vm2 = vmmov 0   ;;  %v503_v62 = vlaneseq  ;;  %vm527_vm7 = vcmask 7168  }
  0x27   :  { %v747_v43 = vld [vmem:[%s991_s3 + $0x20] sm:$0xff]   ;;  %v748_v44 = vld [vmem:[%s991_s3 + $0x28] sm:$0xff]   ;;  %v749_v45 = vld [vmem:[%s991_s3 + $0x30] sm:$0xff]   ;;  %698 = vmatprep.mubr.msk.bf16.mxu0 %vm784_vm2, %v783_v38  ;;  %s785_s18 = smov 1   ;;  %vm566_vm8 = vcmask 8192  }
  0x28   :  { %685 = vmatpush3.bf16.msra.mxu0 %v744_v40  ;;  %v750_v46 = vld [vmem:[%s991_s3 + $0x38] sm:$0xff]   ;;  %v582_v49 = vld [vmem:[%s990_s2] ss:$0 sm:$0xff]  ;;  %v504_v63 = vand.u32 127, %v503_v62 }
  0x29   :  { %686 = vmatprep.subr.bf16.mxu0 %v783_v38  ;;  %v620_v0 = vld [vmem:[%s992_s4] ss:$0 sm:$0xff] }
  0x2a   :  { %vm535_vm3 = vcmp.ge.s32.totalorder %v504_v63, 10  ;;  %vm536_vm4 = vcmp.lt.s32.totalorder %v504_v63, 20  ;;  %v505_v3 = vld [vmem:[%s993_s5] sm:$0xff]  ;;  %vm508_vm6 = vcmp.lt.s32.totalorder %v504_v63, 10 }
  0x2b   :  { %vm959_vm5 = vmand %vm535_vm3, %vm536_vm4  ;;  %v506_v25 = vld [vmem:[%s994_s6] sm:$0xff]  ;;  %s786_s6 = smov [#allocation2]  }
  0x2c   :  { %687 = vmatpush3.bf16.msra.mxu0 %v745_v41  ;;  %s574_s19 = sshll.u32 %s786_s6, 4  ;;  %s575_s19 = int_to_ptr.vmem [resolvable:$true] %s574_s19 }
  0x2d   :  { %688 = vmatprep.subr.bf16.mxu0 %v783_v38  ;;  %s759_s20 = scalar_lea.vmem %s575_s19, 16  ;;  %s763_s21 = scalar_lea.vmem %s575_s19, 32 }
  0x2e   :  { %p760_p0 = scmp.ne.s32.totalorder %s575_s19, %s759_s20  ;;  %p764_p1 = scmp.lt.s32.totalorder %s575_s19, %s575_s19 }
  0x2f   :  { %p765_p2 = scmp.lt.s32.totalorder %s763_s21, %s759_s20 }
  0x30   :  { %689 = vmatpush3.bf16.msra.mxu0 %v746_v42 }
  0x31   :  { %690 = vmatprep.subr.bf16.mxu0 %v783_v38  ;;  %p766_p3 = por %p765_p2, %p764_p1 }
  0x33   :  { %p767_p4 = pnand %p766_p3, %p760_p0 }
  0x34   :  { %691 = vmatpush3.bf16.msra.mxu0 %v747_v43 }
  0x35   :  { %692 = vmatprep.subr.bf16.mxu0 %v783_v38 }
  0x38   :  { %693 = vmatpush3.bf16.msra.mxu0 %v748_v44 }
  0x39   :  { %694 = vmatprep.subr.bf16.mxu0 %v783_v38 }
  0x3c   :  { %695 = vmatpush3.bf16.msra.mxu0 %v749_v45 }
  0x3d   :  { %696 = vmatprep.subr.bf16.mxu0 %v783_v38 }
  0x40   :  { %697 = vmatpush3.bf16.msra.mxu0 %v750_v46 }
  0xf6   :  { %v645_v47 = vpop.f32.mrb[0].mxu0 }
  0xf7   :  { %v667_v48 = vpop.f32.mrb[0].mxu1  ;;  %v646_v50 = vpop.f32.mrb[1].mxu0 }
  0xf8   :  { %v647_v51 = vadd.f32 %v646_v50, %v645_v47  ;;  %v668_v52 = vpop.f32.mrb[1].mxu1  ;;  %v648_v53 = vpop.f32.mrb[2].mxu0 }
  0xf9   :  { %v669_v54 = vadd.f32 %v668_v52, %v667_v48  ;;  %v670_v55 = vpop.f32.mrb[2].mxu1  ;;  %v649_v56 = vpop.f32.mrb[3].mxu0 }
  0xfa   :  { %v345_v57 = vadd.f32 %v647_v51, %v582_v49  ;;  %v671_v58 = vpop.f32.mrb[3].mxu1 }
  0xfc   :  { %v385_v59 = vadd.f32 %v669_v54, %v345_v57 }
  0xfe   :  { %v390_v60 = vmax.f32 %v385_v59, 0.0 }
 0x100   :  { %v391_v61 = vpack.c.bf16 %v390_v60, %v390_v60 }
 0x102   :  { %699 = vmatmul.mubr.bf16.vlgmr.msra.gmra.mrb[4].mxu0 %v391_v61 }
 0x1d5   :  { %v497_v1 = vpop.f32.mrb[4].mxu0 }
 0x1d6   :  { %v498_v4 = vadd.f32 %v620_v0, %v497_v1  ;;  %v700_v5 = vpop.f32.mrb[5].mxu0 }
 0x1d7   :  { %v500_v6 = vpop.f32.mrb[6].mxu0 }
 0x1d8   :  { %v701_v7 = vpop.f32.mrb[7].mxu0  ;;  %v538_v8 = vsel %vm959_vm5, %v498_v4, -inf  ;;  %v521_v9 = vmul.f32 %v505_v3, %v498_v4  ;;  %v510_v12 = vsel %vm508_vm6, %v498_v4, -inf }
 0x1d9   :  { %539 = vmax.xlane.f32.xlu0 %v538_v8 }
 0x1da   :  { %v549_v10 = vsel %vm959_vm5, %v521_v9, 0.0  ;;  %v522_v11 = vsel %vm508_vm6, %v521_v9, 0.0 }
 0x1dd   :  { %511 = vmax.xlane.f32.xlu0 %v510_v12 }
 0x266   :  { %v540_v13 = vpop.xlane.xlu0 %539 }
 0x267   :  { %v541_v14 = vsub.f32 %v538_v8, %v540_v13 }
 0x269   :  { %v542_v15 = vmul.f32 1.442695, %v541_v14 }
 0x26a   :  { %v512_v16 = vpop.xlane.xlu0 %511 }
 0x26b   :  { %v513_v17 = vsub.f32 %v510_v12, %v512_v16  ;;  %751 = vpow2.f32 %v542_v15 }
 0x26d   :  { %v514_v18 = vmul.f32 1.442695, %v513_v17 }
 0x26f   :  { %753 = vpow2.f32 %v514_v18 }
 0x275   :  { %v752_v19 = vpop.eup %751 }
 0x276   :  { %544 = vadd.xlane.f32.xlu1 %v752_v19 }
 0x279   :  { %v754_v20 = vpop.eup %753 }
 0x27a   :  { %550 = vadd.xlane.f32.xlu1 %v549_v10  ;;  %516 = vadd.xlane.f32.xlu0 %v754_v20 }
 0x27e   :  { %523 = vadd.xlane.f32.xlu1 %v522_v11 }
 0x303   :  { %v545_v21 = vpop.xlane.xlu1 %544 }
 0x304   :  { %755 = vlog2.f32 %v545_v21 }
 0x307   :  { %v551_v26 = vpop.xlane.xlu1 %550  ;;  %v517_v36 = vpop.xlane.xlu0 %516 }
 0x308   :  { %757 = vlog2.f32 %v517_v36 }
 0x30b   :  { %v524_v40 = vpop.xlane.xlu1 %523 }
 0x30e   :  { %v756_v22 = vpop.eup %755 }
 0x30f   :  { %v547_v23 = vmul.f32 0.6931472, %v756_v22 }
 0x311   :  { %v548_v24 = vadd.f32 %v547_v23, %v540_v13 }
 0x312   :  { %v758_v37 = vpop.eup %757 }
 0x313   :  { %v552_v27 = vsub.f32 %v548_v24, %v551_v26  ;;  %v519_v38 = vmul.f32 0.6931472, %v758_v37 }
 0x315   :  { %v553_v28 = vmul.f32 %v552_v27, %v506_v25  ;;  %v520_v39 = vadd.f32 %v519_v38, %v512_v16 }
 0x317   :  { %v554_v29 = vsel %vm527_vm7, %v553_v28, 0.0  ;;  %v525_v41 = vsub.f32 %v520_v39, %v524_v40 }
 0x318   :  { %v555_v30 = vrot.slane %v554_v29, 4 }
 0x319   :  { %v526_v42 = vmul.f32 %v525_v41, %v506_v25 }
 0x31a   :  { %v556_v31 = vadd.f32 %v555_v30, %v554_v29 }
 0x31b   :  { %v528_v43 = vsel %vm527_vm7, %v526_v42, 0.0 }
 0x31c   :  { %v557_v32 = vrot.slane %v556_v31, 2  ;;  %v529_v44 = vrot.slane %v528_v43, 4 }
 0x31e   :  { %v558_v33 = vadd.f32 %v557_v32, %v556_v31  ;;  %v530_v45 = vadd.f32 %v529_v44, %v528_v43 }
 0x320   :  { %v559_v34 = vrot.slane %v558_v33, 1  ;;  %v531_v46 = vrot.slane %v530_v45, 2 }
 0x322   :  { %v560_v35 = vadd.f32 %v559_v34, %v558_v33  ;;  %v532_v47 = vadd.f32 %v531_v46, %v530_v45 }
 0x324   :  { %562 = vrot.lane.b32.xlu0 %v560_v35, %s785_s18  ;;  %v533_v48 = vrot.slane %v532_v47, 1 }
 0x326   :  { %v534_v49 = vadd.f32 %v533_v48, %v532_v47 }
 0x396   :  { %v563_v50 = vpop.permute.xlu0 %562 }
 0x397   :  { %v565_v51 = vsel %vm527_vm7, %v534_v49, %v563_v50 }
 0x398   :  { %567 = vst.msk [vmem:[#allocation2] sm:$0x1] %vm566_vm8, %v565_v51 }
 0x399   :  { %770 = shalt.err (!%p767_p4)
}
 0x39a   :  { %s771_s24 = scalar_lea.hbm %s995_s7, 16 }
 0x39b   :  { %p772_p5 = scmp.ne.s32.totalorder %s995_s7, %s771_s24  ;;  %p775_p6 = scmp.lt.u32.totalorder %s771_s24, %s995_s7 }
 0x39d   :  { %p777_p7 = pnand %p775_p6, %p772_p5 }
 0x39f   :  { %780 = shalt.err (!%p777_p7)
}
 0x3a0   :  { %577 = dma.vmem_to_hbm [thread:$0]  %s575_s19, 16, %s995_s7, [#allocation3]  }
 0x3a1   :  { %781 = dma.done.wait [#allocation3], 16  }
 0x3a2   :  { %782 = vsyncadd [#allocation3], 4294967280 }
 0x3a3   :  { %581 = vsyncpa [#allocation3], 1 }

</bundles_post_ra>
